<compile_context>
chip_gen: v7x
topology: tpu7x:2x2x1
jax: 0.10.0
libtpu: 0.0.40
codegen_flags: <defaults>
</compile_context>

<pallas_src>
import numpy as np
import jax
import jax.numpy as jnp
from jax.experimental import pallas as pl
from jax.experimental.pallas import tpu as pltpu


# ----------------------------- configuration --------------------------------

def build_config(chunk_size, num_electrodes, F1, F2, D, kernel_1, kernel_2,
                 num_classes=1):
    P1, P2 = kernel_1 // 2, kernel_2 // 2
    T = chunk_size
    T1 = T + 2 * P1 - kernel_1 + 1    # after block1 temporal conv (with padding)
    Tp1 = T1 // 4                     # after AvgPool(1,4)
    Tp1pad = Tp1 + 2 * P2             # zero-padded input of block2 depthwise conv
    T2 = Tp1pad - kernel_2 + 1        # after block2 depthwise conv
    Tp2 = T2 // 8                     # after AvgPool(1,8)
    NCP = ((num_classes + 127) // 128) * 128   # lane-padded head width
    return dict(T=T, E=num_electrodes, F1=F1, F2=F2, D=D, C2=F1 * D,
                K1=kernel_1, K2=kernel_2, P1=P1, P2=P2, NC=num_classes, NCP=NCP,
                T1=T1, Tp1=Tp1, Tp1pad=Tp1pad, T2=T2, Tp2=Tp2, feat=F2 * Tp2)


def _round_up(a, m):
    return ((a + m - 1) // m) * m


# ----------------------------- parameters ------------------------------------

def init_params(key, cfg):
    ks = jax.random.split(key, 8)
    eps = 1e-3
    F1, E, C2, F2 = cfg["F1"], cfg["E"], cfg["C2"], cfg["F2"]

    w1 = 0.3 * jax.random.normal(ks[0], (F1, cfg["K1"]), jnp.float32)   # (F1,1,1,K1)
    w2 = 0.5 * jax.random.normal(ks[1], (C2, E), jnp.float32)           # (C2,1,E,1)
    # Conv2dWithConstraint: torch.renorm(p=2, dim=0, maxnorm=1)
    nrm = jnp.sqrt(jnp.sum(w2 * w2, axis=1, keepdims=True))
    w2 = w2 * jnp.minimum(1.0, 1.0 / jnp.maximum(nrm, 1e-12))
    w3 = 0.4 * jax.random.normal(ks[2], (C2, cfg["K2"]), jnp.float32)   # (C2,1,1,K2)
    w4 = 0.5 * jax.random.normal(ks[3], (F2, C2), jnp.float32)          # (F2,C2,1,1)
    wlin = 0.5 * jax.random.normal(ks[4], (cfg["NC"], cfg["feat"]), jnp.float32)

    def bn(c, k):  # eval-mode BatchNorm2d folded to per-channel scale/bias
        kg, kb = jax.random.split(k)
        gamma = 1.0 + 0.1 * jax.random.normal(kg, (c,), jnp.float32)
        beta = 0.1 * jax.random.normal(kb, (c,), jnp.float32)
        mean = jnp.zeros((c,), jnp.float32)
        var = jnp.ones((c,), jnp.float32)
        scale = gamma / jnp.sqrt(var + eps)
        bias = beta - mean * scale
        return scale, bias

    s1, b1 = bn(F1, ks[5])
    s2, b2 = bn(C2, ks[6])
    s3, b3 = bn(F2, ks[7])
    return dict(w1=w1, w2=w2, w3=w3, w4=w4, wlin=wlin,
                s1=s1, b1=b1, s2=s2, b2=b2, s3=s3, b3=b3)


# ------------------- host-side operator folding (weights only) ---------------

def build_folded_weights(params, cfg):
    E, T = cfg["E"], cfg["T"]
    F1, D, C2, F2 = cfg["F1"], cfg["D"], cfg["C2"], cfg["F2"]
    K1, K2, P1, P2 = cfg["K1"], cfg["K2"], cfg["P1"], cfg["P2"]
    T1, Tp1, Tp1pad, T2, Tp2 = (cfg["T1"], cfg["Tp1"], cfg["Tp1pad"],
                                cfg["T2"], cfg["Tp2"])
    NC, NCP = cfg["NC"], cfg["NCP"]

    w1 = np.asarray(params["w1"], np.float32)
    w2 = np.asarray(params["w2"], np.float32)
    w3 = np.asarray(params["w3"], np.float32)
    w4 = np.asarray(params["w4"], np.float32)
    wlin = np.asarray(params["wlin"], np.float32)
    s1 = np.asarray(params["s1"], np.float32); b1 = np.asarray(params["b1"], np.float32)
    s2 = np.asarray(params["s2"], np.float32); b2 = np.asarray(params["b2"], np.float32)
    s3 = np.asarray(params["s3"], np.float32); b3 = np.asarray(params["b3"], np.float32)

    # --- block1 temporal Toeplitz (valid conv on padded time), then drop the
    #     zero-pad rows so the operator acts on the UNPADDED input (K = E*T).
    Tpad = T + 2 * P1
    toep1 = np.zeros((F1, Tpad, T1), np.float32)
    idx1 = np.arange(T1)
    for k in range(K1):
        toep1[:, idx1 + k, idx1] = w1[:, k][:, None]
    toep1 = toep1[:, P1:P1 + T, :]                                # (F1, T, T1)

    # wb1[(e,t),(c2,tc)] = s2[c2]*s1[f1(c2)]*w2[c2,e]*toep1[f1(c2), t, tc]
    wb1 = np.zeros((E * T, C2 * T1), np.float32)
    for c2 in range(C2):
        f1 = c2 // D
        coef = (s2[c2] * s1[f1]) * toep1[f1]                      # (T, T1)
        for e in range(E):
            wb1[e * T:(e + 1) * T, c2 * T1:(c2 + 1) * T1] = w2[c2, e] * coef
    # bias: BN1 bias pushed through the spatial conv, plus BN2 bias
    bias1 = s2 * (b1[np.arange(C2) // D] * w2.sum(axis=1)) + b2   # (C2,)
    bb1 = np.repeat(bias1, T1)[None, :]                           # (1, C2*T1)

    # --- wp12 = AvgPool(1,4) ∘ zero-pad ∘ depthwise conv ∘ 1x1 conv ∘ BN3-scale
    pool4 = np.zeros((T1, Tp1pad), np.float32)
    for j in range(Tp1):
        pool4[j * 4:(j + 1) * 4, P2 + j] = 0.25
    toep2 = np.zeros((C2, Tp1pad, T2), np.float32)
    idx2 = np.arange(T2)
    for k in range(K2):
        toep2[:, idx2 + k, idx2] = w3[:, k][:, None]
    wp12 = np.zeros((C2 * T1, F2 * T2), np.float32)
    for c2 in range(C2):
        pt2 = pool4 @ toep2[c2]                                   # (T1, T2)
        for f2 in range(F2):
            wp12[c2 * T1:(c2 + 1) * T1, f2 * T2:(f2 + 1) * T2] = \
                (s3[f2] * w4[f2, c2]) * pt2
    bb2 = np.repeat(b3, T2)[None, :]                              # (1, F2*T2)

    # --- head: AvgPool(1,8) ∘ flatten(channel-major) ∘ Linear (no bias),
    #     lane-padded to NCP output columns (zeros beyond NC).
    whead = np.zeros((F2 * T2, NCP), np.float32)
    for f2 in range(F2):
        for j in range(Tp2):
            whead[f2 * T2 + j * 8: f2 * T2 + (j + 1) * 8, :NC] = \
                (wlin[:, f2 * Tp2 + j] / 8.0)[None, :]

    # bf16 storage for the matmul operators (MXU-native); f32 bias rows.
    return dict(wb1=jnp.asarray(wb1, jnp.bfloat16),
                bb1=jnp.asarray(bb1, jnp.float32),
                wp12=jnp.asarray(wp12, jnp.bfloat16),
                bb2=jnp.asarray(bb2, jnp.float32),
                whead=jnp.asarray(whead, jnp.bfloat16))


# ----------------------------- Pallas kernel ---------------------------------

def _elu(v):
    return jnp.where(v > 0, v, jnp.exp(jnp.minimum(v, 0.0)) - 1.0)


def eegnet_kernel(x_ref, wb1_ref, bb1_ref, wp12_ref, bb2_ref, wh_ref, o_ref):
    # x_ref: (Bb, E*T) bf16 — batch on sublanes, (electrode,time) on lanes.
    x = x_ref[...]
    # block1: temporal conv ∘ BN1 ∘ spatial conv ∘ BN2, ELU in f32, cast to bf16.
    z = jnp.dot(x, wb1_ref[...], preferred_element_type=jnp.float32) + bb1_ref[...]
    z = _elu(z).astype(jnp.bfloat16)                              # (Bb, C2*T1)
    # AvgPool(1,4) ∘ block2 convs ∘ BN3-scale fused into one operator.
    v = jnp.dot(z, wp12_ref[...], preferred_element_type=jnp.float32) + bb2_ref[...]
    v = _elu(v).astype(jnp.bfloat16)                              # (Bb, F2*T2)
    # AvgPool(1,8) ∘ flatten ∘ linear head; lane-dense output written once.
    o_ref[...] = jnp.dot(v, wh_ref[...], preferred_element_type=jnp.float32)


def eegnet_forward(x, params, cfg, folded=None, block_batch=512):
    """x: (N, 1, E, T) float32 (NCHW, like PyTorch).  Returns (N,) float32."""
    N = x.shape[0]
    E, T, NCP = cfg["E"], cfg["T"], cfg["NCP"]
    if folded is None:
        folded = build_folded_weights(params, cfg)

    # Layout plumbing only: drop the singleton channel, flatten (electrode,time)
    # onto lanes (K = E*T, no time padding needed), feed bf16.
    x2d = x[:, 0].reshape(N, E * T).astype(jnp.bfloat16)

    if N <= 8:
        Bb, Np = N, N                        # tiny batch: whole batch, one step
    else:
        # >= 2 grid steps so the "parallel" axis shards across v7x's two TCs;
        # rows a multiple of 8 (sublane constraint); cap per-step rows.
        Bb = min(block_batch, _round_up(-(-N // 2), 8))
        Np = _round_up(N, Bb)
    if Np != N:
        x2d = jnp.pad(x2d, ((0, Np - N), (0, 0)))
    nb = Np // Bb

    weights = (folded["wb1"], folded["bb1"], folded["wp12"],
               folded["bb2"], folded["whead"])

    def wspec(a):
        # Constant-index weight blocks (resident across the batch grid).
        return pl.BlockSpec(a.shape, lambda b, _nd=a.ndim: (0,) * _nd)

    out = pl.pallas_call(
        eegnet_kernel,
        out_shape=jax.ShapeDtypeStruct((Np, NCP), jnp.float32),
        grid=(nb,),
        in_specs=[pl.BlockSpec((Bb, E * T), lambda b: (b, 0))]
                 + [wspec(a) for a in weights],
        out_specs=pl.BlockSpec((Bb, NCP), lambda b: (b, 0)),
        compiler_params=pltpu.CompilerParams(
            dimension_semantics=("parallel",)),
    )(x2d, *weights)
    return out[:N, 0]


# ----------------------------- pure-JAX reference ----------------------------

def eegnet_reference(x, params, cfg):
    N = x.shape[0]
    dn = ("NCHW", "OIHW", "NCHW")
    HI = jax.lax.Precision.HIGHEST
    F1, D, C2, F2 = cfg["F1"], cfg["D"], cfg["C2"], cfg["F2"]

    y = jax.lax.conv_general_dilated(
        x, params["w1"].reshape(F1, 1, 1, cfg["K1"]), (1, 1),
        [(0, 0), (cfg["P1"], cfg["P1"])], dimension_numbers=dn, precision=HI)
    y = y * params["s1"].reshape(1, F1, 1, 1) + params["b1"].reshape(1, F1, 1, 1)
    y = jax.lax.conv_general_dilated(
        y, params["w2"].reshape(C2, 1, cfg["E"], 1), (1, 1),
        [(0, 0), (0, 0)], dimension_numbers=dn, feature_group_count=F1, precision=HI)
    y = y * params["s2"].reshape(1, C2, 1, 1) + params["b2"].reshape(1, C2, 1, 1)
    y = _elu(y)
    tp1 = y.shape[-1] // 4
    y = y[..., :tp1 * 4].reshape(N, C2, 1, tp1, 4).mean(-1)
    y = jax.lax.conv_general_dilated(
        y, params["w3"].reshape(C2, 1, 1, cfg["K2"]), (1, 1),
        [(0, 0), (cfg["P2"], cfg["P2"])], dimension_numbers=dn,
        feature_group_count=C2, precision=HI)
    y = jax.lax.conv_general_dilated(
        y, params["w4"].reshape(F2, C2, 1, 1), (1, 1),
        [(0, 0), (0, 0)], dimension_numbers=dn, precision=HI)
    y = y * params["s3"].reshape(1, F2, 1, 1) + params["b3"].reshape(1, F2, 1, 1)
    y = _elu(y)
    tp2 = y.shape[-1] // 8
    y = y[..., :tp2 * 8].reshape(N, F2, 1, tp2, 8).mean(-1)
    feat = y.reshape(N, -1)                              # flatten(start_dim=1)
    return jnp.dot(feat, params["wlin"].T, precision=HI)[:, 0]


# ----------------------------- main -------------------------------------------

if __name__ == "__main__":
    # Small EEGNet consistent with the module: chunk_size=64, num_electrodes=16,
    # F1=4, F2=8, D=2, kernel_1=16, kernel_2=8, input_channels=1, num_classes=1.
    cfg = build_config(chunk_size=64, num_electrodes=16, F1=4, F2=8, D=2,
                       kernel_1=16, kernel_2=8, num_classes=1)
    key = jax.random.PRNGKey(0)
    kx, kp = jax.random.split(key)
    N = 2
    x = jax.random.normal(kx, (N, 1, cfg["E"], cfg["T"]), jnp.float32)  # NCHW
    params = init_params(kp, cfg)
    folded = build_folded_weights(params, cfg)

    out = eegnet_forward(x, params, cfg, folded=folded)
    out = jax.block_until_ready(out)

    ref = eegnet_reference(x, params, cfg)
    assert out.shape == (N,)
    # Kernel stores operands in bf16 with f32 MXU accumulation; reference is
    # f32 HIGHEST, so compare with a bf16-level tolerance.
    if not np.allclose(np.asarray(out), np.asarray(ref), atol=5e-2, rtol=5e-2):
        raise AssertionError(f"mismatch: pallas={np.asarray(out)} ref={np.asarray(ref)}")
    print("KERNEL_OK")
</pallas_src>

<mosaic_0001>
module attributes {stable_mosaic.version = 11 : i64} {
  func.func @eegnet_kernel(%arg0: i32, %arg1: memref<2x1024xbf16, #tpu.memory_space<vmem>>, %arg2: memref<1024x520xbf16, #tpu.memory_space<vmem>>, %arg3: memref<1x520xf32, #tpu.memory_space<vmem>>, %arg4: memref<520x136xbf16, #tpu.memory_space<vmem>>, %arg5: memref<1x136xf32, #tpu.memory_space<vmem>>, %arg6: memref<136x128xbf16, #tpu.memory_space<vmem>>, %arg7: memref<2x128xf32, #tpu.memory_space<vmem>>) attributes {dimension_semantics = [#tpu.dimension_semantics<parallel>], iteration_bounds = array<i64: 1>, scalar_prefetch = 0 : i64, scratch_operands = 0 : i64, tpu.core_type = #tpu.core_type<tc>, window_params = [{transform_indices = @transform_0, window_bounds = array<i64: 2, 1024>}, {pipeline_mode = #tpu.pipeline_mode<synchronous>, transform_indices = @transform_1, window_bounds = array<i64: 1024, 520>}, {pipeline_mode = #tpu.pipeline_mode<synchronous>, transform_indices = @transform_2, window_bounds = array<i64: 1, 520>}, {pipeline_mode = #tpu.pipeline_mode<synchronous>, transform_indices = @transform_3, window_bounds = array<i64: 520, 136>}, {pipeline_mode = #tpu.pipeline_mode<synchronous>, transform_indices = @transform_4, window_bounds = array<i64: 1, 136>}, {pipeline_mode = #tpu.pipeline_mode<synchronous>, transform_indices = @transform_5, window_bounds = array<i64: 136, 128>}, {transform_indices = @transform_6, window_bounds = array<i64: 2, 128>}]} {
    %c0 = arith.constant 0 : index
    %c0_0 = arith.constant 0 : index
    %0 = vector.load %arg1[%c0, %c0_0] : memref<2x1024xbf16, #tpu.memory_space<vmem>>, vector<2x1024xbf16>
    %c0_1 = arith.constant 0 : index
    %c0_2 = arith.constant 0 : index
    %1 = vector.load %arg2[%c0_1, %c0_2] : memref<1024x520xbf16, #tpu.memory_space<vmem>>, vector<1024x520xbf16>
    %cst = arith.constant dense<0.000000e+00> : vector<2x520xf32>
    %2 = tpu.matmul %0, %1, %cst {dimension_numbers = #tpu.dot_dimension_numbers<[1], [0], [0], [1], [0, 0, 1, 1], [], []>} : vector<2x1024xbf16>, vector<1024x520xbf16>, vector<2x520xf32> -> vector<2x520xf32>
    %c0_3 = arith.constant 0 : index
    %c0_4 = arith.constant 0 : index
    %3 = vector.load %arg3[%c0_3, %c0_4] : memref<1x520xf32, #tpu.memory_space<vmem>>, vector<1x520xf32>
    %4 = vector.broadcast %3 : vector<1x520xf32> to vector<2x520xf32>
    %5 = arith.addf %2, %4 : vector<2x520xf32>
    %cst_5 = arith.constant 0.000000e+00 : f32
    %6 = vector.broadcast %cst_5 : f32 to vector<2x520xf32>
    %7 = arith.cmpf ogt, %5, %6 : vector<2x520xf32>
    %cst_6 = arith.constant 0.000000e+00 : f32
    %8 = vector.broadcast %cst_6 : f32 to vector<2x520xf32>
    %9 = arith.minimumf %5, %8 : vector<2x520xf32>
    %10 = math.exp %9 : vector<2x520xf32>
    %cst_7 = arith.constant 1.000000e+00 : f32
    %11 = vector.broadcast %cst_7 : f32 to vector<2x520xf32>
    %12 = arith.subf %10, %11 : vector<2x520xf32>
    %13 = arith.select %7, %5, %12 : vector<2x520xi1>, vector<2x520xf32>
    %14 = arith.truncf %13 : vector<2x520xf32> to vector<2x520xbf16>
    %c0_8 = arith.constant 0 : index
    %c0_9 = arith.constant 0 : index
    %15 = vector.load %arg4[%c0_8, %c0_9] : memref<520x136xbf16, #tpu.memory_space<vmem>>, vector<520x136xbf16>
    %cst_10 = arith.constant dense<0.000000e+00> : vector<2x136xf32>
    %16 = tpu.matmul %14, %15, %cst_10 {dimension_numbers = #tpu.dot_dimension_numbers<[1], [0], [0], [1], [0, 0, 1, 1], [], []>} : vector<2x520xbf16>, vector<520x136xbf16>, vector<2x136xf32> -> vector<2x136xf32>
    %c0_11 = arith.constant 0 : index
    %c0_12 = arith.constant 0 : index
    %17 = vector.load %arg5[%c0_11, %c0_12] : memref<1x136xf32, #tpu.memory_space<vmem>>, vector<1x136xf32>
    %18 = vector.broadcast %17 : vector<1x136xf32> to vector<2x136xf32>
    %19 = arith.addf %16, %18 : vector<2x136xf32>
    %cst_13 = arith.constant 0.000000e+00 : f32
    %20 = vector.broadcast %cst_13 : f32 to vector<2x136xf32>
    %21 = arith.cmpf ogt, %19, %20 : vector<2x136xf32>
    %cst_14 = arith.constant 0.000000e+00 : f32
    %22 = vector.broadcast %cst_14 : f32 to vector<2x136xf32>
    %23 = arith.minimumf %19, %22 : vector<2x136xf32>
    %24 = math.exp %23 : vector<2x136xf32>
    %cst_15 = arith.constant 1.000000e+00 : f32
    %25 = vector.broadcast %cst_15 : f32 to vector<2x136xf32>
    %26 = arith.subf %24, %25 : vector<2x136xf32>
    %27 = arith.select %21, %19, %26 : vector<2x136xi1>, vector<2x136xf32>
    %28 = arith.truncf %27 : vector<2x136xf32> to vector<2x136xbf16>
    %c0_16 = arith.constant 0 : index
    %c0_17 = arith.constant 0 : index
    %29 = vector.load %arg6[%c0_16, %c0_17] : memref<136x128xbf16, #tpu.memory_space<vmem>>, vector<136x128xbf16>
    %cst_18 = arith.constant dense<0.000000e+00> : vector<2x128xf32>
    %30 = tpu.matmul %28, %29, %cst_18 {dimension_numbers = #tpu.dot_dimension_numbers<[1], [0], [0], [1], [0, 0, 1, 1], [], []>} : vector<2x136xbf16>, vector<136x128xbf16>, vector<2x128xf32> -> vector<2x128xf32>
    %c0_19 = arith.constant 0 : index
    %c0_20 = arith.constant 0 : index
    %31 = vector.load %arg7[%c0_19, %c0_20] : memref<2x128xf32, #tpu.memory_space<vmem>>, vector<2x128xf32>
    tpu.vector_store %arg7[%c0_19, %c0_20], %30 {strides = array<i32>} : memref<2x128xf32, #tpu.memory_space<vmem>>, vector<2x128xf32>,
    return
  }
  func.func @transform_0(%arg0: i32) -> (i32, i32) {
    %c0_i32 = arith.constant 0 : i32
    %c0_i32_0 = arith.constant 0 : i32
    return %arg0, %c0_i32 : i32, i32
  }
  func.func @transform_1(%arg0: i32) -> (i32, i32) {
    %c0_i32 = arith.constant 0 : i32
    %c0_i32_0 = arith.constant 0 : i32
    %c0_i32_1 = arith.constant 0 : i32
    return %c0_i32, %c0_i32_0 : i32, i32
  }
  func.func @transform_2(%arg0: i32) -> (i32, i32) {
    %c0_i32 = arith.constant 0 : i32
    %c0_i32_0 = arith.constant 0 : i32
    %c0_i32_1 = arith.constant 0 : i32
    return %c0_i32, %c0_i32_0 : i32, i32
  }
  func.func @transform_3(%arg0: i32) -> (i32, i32) {
    %c0_i32 = arith.constant 0 : i32
    %c0_i32_0 = arith.constant 0 : i32
    %c0_i32_1 = arith.constant 0 : i32
    return %c0_i32, %c0_i32_0 : i32, i32
  }
  func.func @transform_4(%arg0: i32) -> (i32, i32) {
    %c0_i32 = arith.constant 0 : i32
    %c0_i32_0 = arith.constant 0 : i32
    %c0_i32_1 = arith.constant 0 : i32
    return %c0_i32, %c0_i32_0 : i32, i32
  }
  func.func @transform_5(%arg0: i32) -> (i32, i32) {
    %c0_i32 = arith.constant 0 : i32
    %c0_i32_0 = arith.constant 0 : i32
    %c0_i32_1 = arith.constant 0 : i32
    return %c0_i32, %c0_i32_0 : i32, i32
  }
  func.func @transform_6(%arg0: i32) -> (i32, i32) {
    %c0_i32 = arith.constant 0 : i32
    %c0_i32_0 = arith.constant 0 : i32
    return %arg0, %c0_i32 : i32, i32
  }
}

</mosaic_0001>

<bundles_post_ra>
// kernel: tpu_custom_call.1
= control target key start
LH: loop header
LB: loop body
LE: loop exit
PB: predicated region body
PF: predicated region fallthrough
CT: control target
= control target key end

     0   :  { %v412_v36 = vlaneseq  ;;  %v4487_v37 = vmov 1966171168   ;;  %s5834_s0 = inlined_call_operand.vmem [shape: bf16[2,1024], index: 0, kind: input, shape index: {}]   ;;  %s5835_s1 = inlined_call_operand.vmem [shape: bf16[1024,520], index: 1, kind: input, shape index: {}]   ;;  %s5836_s2 = inlined_call_operand.vmem [shape: f32[1,520], index: 2, kind: input, shape index: {}]   ;;  %s5837_s3 = inlined_call_operand.vmem [shape: bf16[520,136], index: 3, kind: input, shape index: {}]   ;;  %s5838_s4 = inlined_call_operand.vmem [shape: f32[1,136], index: 4, kind: input, shape index: {}]   ;;  %s5839_s5 = inlined_call_operand.vmem [shape: bf16[136,128], index: 5, kind: input, shape index: {}]   ;;  %s5840_s6 = inlined_call_operand.hbm [shape: f32[2,128], index: 6, kind: output, shape index: {}]  }
   0x1   :  { %v3893_v0 = vld [vmem:[%s5835_s1 + $0x4] ss:$20 sps:$4 sm:$0xff]   ;;  %v3897_v2 = vld [vmem:[%s5835_s1] ss:$20 sps:$4 sm:$0xff]   ;;  %v3903_v6 = vld [vmem:[%s5835_s1 + $0x28] ss:$20 sps:$4 sm:$0xff]   ;;  %v440_v38 = vunpack.c.l.s4 %v4487_v37 }
   0x2   :  { %v3895_v1 = vld [vmem:[%s5835_s1 + $0x284] ss:$20 sps:$4 sm:$0xff]   ;;  %2159 = vmatprep.subr.bf16.mxu1 %v3893_v0  ;;  %v3898_v3 = vld [vmem:[%s5835_s1 + $0x280] ss:$20 sps:$4 sm:$0xff]   ;;  %v3904_v7 = vld [vmem:[%s5835_s1 + $0x2a8] ss:$20 sps:$4 sm:$0xff]  }
   0x3   :  { %2200 = vmatprep.subr.bf16.mxu0 %v3895_v1  ;;  %v3899_v4 = vld [vmem:[%s5835_s1 + $0x2c] ss:$20 sps:$4 sm:$0xff]   ;;  %2160 = vmatpush1.bf16.msra.mxu1 %v3897_v2  ;;  %v3905_v8 = vld [vmem:[%s5835_s1 + $0x54] ss:$20 sps:$4 sm:$0xff]   ;;  %v3909_v10 = vld [vmem:[%s5835_s1 + $0x50] ss:$20 sps:$4 sm:$0xff]   ;;  %v441_v43 = vunpack.c.0.s8 %v440_v38 }
   0x4   :  { %2201 = vmatpush1.bf16.msra.mxu0 %v3898_v3  ;;  %v3901_v5 = vld [vmem:[%s5835_s1 + $0x2ac] ss:$20 sps:$4 sm:$0xff]   ;;  %2161 = vmatprep.subr.bf16.mxu1 %v3899_v4  ;;  %v3907_v9 = vld [vmem:[%s5835_s1 + $0x2d4] ss:$20 sps:$4 sm:$0xff]   ;;  %v3910_v11 = vld [vmem:[%s5835_s1 + $0x2d0] ss:$20 sps:$4 sm:$0xff]  }
   0x5   :  { %2202 = vmatprep.subr.bf16.mxu0 %v3901_v5  ;;  %v3911_v12 = vld [vmem:[%s5835_s1 + $0x7c] ss:$20 sps:$4 sm:$0xff]   ;;  %v3915_v14 = vld [vmem:[%s5835_s1 + $0x78] ss:$20 sps:$4 sm:$0xff]   ;;  %v3921_v18 = vld [vmem:[%s5835_s1 + $0xa0] ss:$20 sps:$4 sm:$0xff]  }
   0x6   :  { %v3913_v13 = vld [vmem:[%s5835_s1 + $0x2fc] ss:$20 sps:$4 sm:$0xff]   ;;  %v3916_v15 = vld [vmem:[%s5835_s1 + $0x2f8] ss:$20 sps:$4 sm:$0xff]   ;;  %v3922_v19 = vld [vmem:[%s5835_s1 + $0x320] ss:$20 sps:$4 sm:$0xff]  }
   0x7   :  { %2162 = vmatpush1.bf16.msra.mxu1 %v3903_v6  ;;  %v3917_v16 = vld [vmem:[%s5835_s1 + $0xa4] ss:$20 sps:$4 sm:$0xff]   ;;  %v3923_v20 = vld [vmem:[%s5835_s1 + $0xcc] ss:$20 sps:$4 sm:$0xff]   ;;  %v3927_v22 = vld [vmem:[%s5835_s1 + $0xc8] ss:$20 sps:$4 sm:$0xff]  }
   0x8   :  { %2203 = vmatpush1.bf16.msra.mxu0 %v3904_v7  ;;  %2163 = vmatprep.subr.bf16.mxu1 %v3905_v8  ;;  %v3919_v17 = vld [vmem:[%s5835_s1 + $0x324] ss:$20 sps:$4 sm:$0xff]   ;;  %v3925_v21 = vld [vmem:[%s5835_s1 + $0x34c] ss:$20 sps:$4 sm:$0xff]   ;;  %v3928_v23 = vld [vmem:[%s5835_s1 + $0x348] ss:$20 sps:$4 sm:$0xff]  }
   0x9   :  { %2204 = vmatprep.subr.bf16.mxu0 %v3907_v9  ;;  %v3929_v24 = vld [vmem:[%s5835_s1 + $0xf4] ss:$20 sps:$4 sm:$0xff]   ;;  %v3933_v26 = vld [vmem:[%s5835_s1 + $0xf0] ss:$20 sps:$4 sm:$0xff]   ;;  %v3939_v30 = vld [vmem:[%s5835_s1 + $0x118] ss:$20 sps:$4 sm:$0xff]  }
   0xa   :  { %v3931_v25 = vld [vmem:[%s5835_s1 + $0x374] ss:$20 sps:$4 sm:$0xff]   ;;  %v3934_v27 = vld [vmem:[%s5835_s1 + $0x370] ss:$20 sps:$4 sm:$0xff]   ;;  %v3940_v31 = vld [vmem:[%s5835_s1 + $0x398] ss:$20 sps:$4 sm:$0xff]  }
   0xb   :  { %2164 = vmatpush1.bf16.msra.mxu1 %v3909_v10  ;;  %v3935_v28 = vld [vmem:[%s5835_s1 + $0x11c] ss:$20 sps:$4 sm:$0xff]   ;;  %v3941_v32 = vld [vmem:[%s5835_s1 + $0x144] ss:$20 sps:$4 sm:$0xff]   ;;  %v3945_v34 = vld [vmem:[%s5835_s1 + $0x140] ss:$20 sps:$4 sm:$0xff]  }
   0xc   :  { %2205 = vmatpush1.bf16.msra.mxu0 %v3910_v11  ;;  %2165 = vmatprep.subr.bf16.mxu1 %v3911_v12  ;;  %v3937_v29 = vld [vmem:[%s5835_s1 + $0x39c] ss:$20 sps:$4 sm:$0xff]   ;;  %v3943_v33 = vld [vmem:[%s5835_s1 + $0x3c4] ss:$20 sps:$4 sm:$0xff]   ;;  %v3946_v35 = vld [vmem:[%s5835_s1 + $0x3c0] ss:$20 sps:$4 sm:$0xff]  }
   0xd   :  { %2206 = vmatprep.subr.bf16.mxu0 %v3913_v13  ;;  %v3947_v39 = vld [vmem:[%s5835_s1 + $0x16c] ss:$20 sps:$4 sm:$0xff]   ;;  %v3951_v41 = vld [vmem:[%s5835_s1 + $0x168] ss:$20 sps:$4 sm:$0xff]   ;;  %v4642_v42 = vshrl.u32 %v412_v36, 7 }
   0xe   :  { %v3949_v40 = vld [vmem:[%s5835_s1 + $0x3ec] ss:$20 sps:$4 sm:$0xff]   ;;  %v3952_v44 = vld [vmem:[%s5835_s1 + $0x3e8] ss:$20 sps:$4 sm:$0xff]   ;;  %v3957_v47 = vld [vmem:[%s5835_s1 + $0x190] ss:$20 sps:$4 sm:$0xff]  }
   0xf   :  { %2166 = vmatpush1.bf16.msra.mxu1 %v3915_v14  ;;  %v3953_v45 = vld [vmem:[%s5835_s1 + $0x194] ss:$20 sps:$4 sm:$0xff]   ;;  %v3958_v48 = vld [vmem:[%s5835_s1 + $0x410] ss:$20 sps:$4 sm:$0xff]   ;;  %v4660_v49 = vsub.s32 %v441_v43, %v4642_v42  ;;  %v3963_v53 = vld [vmem:[%s5835_s1 + $0x1b8] ss:$20 sps:$4 sm:$0xff]  }
  0x10   :  { %2207 = vmatpush1.bf16.msra.mxu0 %v3916_v15  ;;  %2167 = vmatprep.subr.bf16.mxu1 %v3917_v16  ;;  %v3955_v46 = vld [vmem:[%s5835_s1 + $0x414] ss:$20 sps:$4 sm:$0xff]   ;;  %v3959_v50 = vld [vmem:[%s5835_s1 + $0x1bc] ss:$20 sps:$4 sm:$0xff]   ;;  %v25_v52 = vld [vmem:[%s5834_s0] sm:$0xff] }
  0x11   :  { %2208 = vmatprep.subr.bf16.mxu0 %v3919_v17  ;;  %v3961_v51 = vld [vmem:[%s5835_s1 + $0x43c] ss:$20 sps:$4 sm:$0xff]   ;;  %v445_v54 = vrot.slane %v25_v52, %v4660_v49  ;;  %v438_v55 = vcombine.high %v25_v52, %v25_v52  ;;  %v3964_v56 = vld [vmem:[%s5835_s1 + $0x438] ss:$20 sps:$4 sm:$0xff]   ;;  %v3969_v61 = vld [vmem:[%s5835_s1 + $0x1e0] ss:$20 sps:$4 sm:$0xff]  }
  0x12   :  { %v3965_v57 = vld [vmem:[%s5835_s1 + $0x1e4] ss:$20 sps:$4 sm:$0xff]   ;;  %v3970_v0 = vld [vmem:[%s5835_s1 + $0x460] ss:$20 sps:$4 sm:$0xff]   ;;  %v3975_v4 = vld [vmem:[%s5835_s1 + $0x208] ss:$20 sps:$4 sm:$0xff]  }
  0x13   :  { %2168 = vmatpush1.bf16.msra.mxu1 %v3921_v18  ;;  %v3967_v58 = vld [vmem:[%s5835_s1 + $0x464] ss:$20 sps:$4 sm:$0xff]   ;;  %v453_v59 = vcombine.high %v445_v54, %v445_v54  ;;  %v452_v60 = vrot.slane %v438_v55, %v4660_v49  ;;  %v3971_v1 = vld [vmem:[%s5835_s1 + $0x20c] ss:$20 sps:$4 sm:$0xff]   ;;  %v3976_v5 = vld [vmem:[%s5835_s1 + $0x488] ss:$20 sps:$4 sm:$0xff]   ;;  %v4737_v13 = vrot.slane %v445_v54, %v4660_v49 }
  0x14   :  { %2209 = vmatpush1.bf16.msra.mxu0 %v3922_v19  ;;  %2169 = vmatprep.subr.bf16.mxu1 %v3923_v20  ;;  %v3973_v2 = vld [vmem:[%s5835_s1 + $0x48c] ss:$20 sps:$4 sm:$0xff]   ;;  %v3977_v6 = vld [vmem:[%s5835_s1 + $0x234] ss:$20 sps:$4 sm:$0xff]   ;;  %v3981_v8 = vld [vmem:[%s5835_s1 + $0x230] ss:$20 sps:$4 sm:$0xff]  }
  0x15   :  { %2210 = vmatprep.subr.bf16.mxu0 %v3925_v21  ;;  %v4689_v62 = vrot.slane %v453_v59, %v4660_v49  ;;  %v4692_v63 = vrot.slane %v452_v60, %v4660_v49  ;;  %v3979_v7 = vld [vmem:[%s5835_s1 + $0x4b4] ss:$20 sps:$4 sm:$0xff]   ;;  %v3982_v9 = vld [vmem:[%s5835_s1 + $0x4b0] ss:$20 sps:$4 sm:$0xff]   ;;  %v3987_v12 = vld [vmem:[%s5835_s1 + $0x258] ss:$20 sps:$4 sm:$0xff]   ;;  %v454_v17 = vcombine.high %v452_v60, %v452_v60  ;;  %v4753_v19 = vcombine.high %v4737_v13, %v4737_v13 }
  0x16   :  { %v3983_v10 = vld [vmem:[%s5835_s1 + $0x25c] ss:$20 sps:$4 sm:$0xff]   ;;  %v3988_v14 = vld [vmem:[%s5835_s1 + $0x4d8] ss:$20 sps:$4 sm:$0xff]   ;;  %v3989_v18 = vld [vmem:[%s5835_s1 + $0x500] ss:$20 sps:$4 sm:$0xff]  }
  0x17   :  { %2170 = vmatpush1.bf16.msra.mxu1 %v3927_v22  ;;  %v4705_v3 = vcombine.high %v4689_v62, %v4689_v62  ;;  %2191 = vmatprep.mubr.bf16.mxu1 %v4689_v62  ;;  %v3985_v11 = vld [vmem:[%s5835_s1 + $0x4dc] ss:$20 sps:$4 sm:$0xff]   ;;  %v3991_v15 = vld [vmem:[%s5835_s1 + $0x504] ss:$20 sps:$4 sm:$0xff]   ;;  %v3994_v16 = vld [vmem:[%s5835_s1 + $0xc] ss:$20 sps:$4 sm:$0xff]  }
  0x18   :  { %2211 = vmatpush1.bf16.msra.mxu0 %v3928_v23  ;;  %2171 = vmatprep.subr.bf16.mxu1 %v3929_v24  ;;  %v3992_v20 = vld [vmem:[%s5835_s1 + $0x8] ss:$20 sps:$4 sm:$0xff]   ;;  %v3997_v21 = vld [vmem:[%s5835_s1 + $0x52c] ss:$20 sps:$4 sm:$0xff]   ;;  %v4765_v23 = vrot.slane %v454_v17, %v4660_v49  ;;  %v4073_v17 = vld [vmem:[%s5835_s1 + $0x730] ss:$20 sps:$4 sm:$0xff]  }
  0x19   :  { %2212 = vmatprep.subr.bf16.mxu0 %v3931_v25  ;;  %2232 = vmatprep.mubr.bf16.mxu0 %v4705_v3  ;;  %v4000_v22 = vld [vmem:[%s5835_s1 + $0x34] ss:$20 sps:$4 sm:$0xff]   ;;  %v3998_v25 = vld [vmem:[%s5835_s1 + $0x30] ss:$20 sps:$4 sm:$0xff]   ;;  %v4021_v38 = vld [vmem:[%s5835_s1 + $0x5cc] ss:$20 sps:$4 sm:$0xff]  }
  0x1a   :  { %v3995_v24 = vld [vmem:[%s5835_s1 + $0x528] ss:$20 sps:$4 sm:$0xff]   ;;  %v4013_v36 = vld [vmem:[%s5835_s1 + $0x5a0] ss:$20 sps:$4 sm:$0xff]   ;;  %v4031_v49 = vld [vmem:[%s5835_s1 + $0x618] ss:$20 sps:$4 sm:$0xff]  }
  0x1b   :  { %2172 = vmatpush1.bf16.msra.mxu1 %v3933_v26  ;;  %v4003_v26 = vld [vmem:[%s5835_s1 + $0x554] ss:$20 sps:$4 sm:$0xff]   ;;  %v4042_v52 = vld [vmem:[%s5835_s1 + $0x14c] ss:$20 sps:$4 sm:$0xff]   ;;  %v4054_v60 = vld [vmem:[%s5835_s1 + $0x19c] ss:$20 sps:$4 sm:$0xff]  }
  0x1c   :  { %2213 = vmatpush1.bf16.msra.mxu0 %v3934_v27  ;;  %2173 = vmatprep.subr.bf16.mxu1 %v3935_v28  ;;  %v4006_v27 = vld [vmem:[%s5835_s1 + $0x5c] ss:$20 sps:$4 sm:$0xff]   ;;  %v4027_v43 = vld [vmem:[%s5835_s1 + $0x5f4] ss:$20 sps:$4 sm:$0xff]   ;;  %v4045_v55 = vld [vmem:[%s5835_s1 + $0x66c] ss:$20 sps:$4 sm:$0xff]  }
  0x1d   :  { %2214 = vmatprep.subr.bf16.mxu0 %v3937_v29  ;;  %v4001_v28 = vld [vmem:[%s5835_s1 + $0x550] ss:$20 sps:$4 sm:$0xff]   ;;  %v4004_v29 = vld [vmem:[%s5835_s1 + $0x58] ss:$20 sps:$4 sm:$0xff]   ;;  %v4016_v37 = vld [vmem:[%s5835_s1 + $0xa8] ss:$20 sps:$4 sm:$0xff]  }
  0x1e   :  { %v4040_v54 = vld [vmem:[%s5835_s1 + $0x148] ss:$20 sps:$4 sm:$0xff]  }
  0x1f   :  { %2174 = vmatpush1.bf16.msra.mxu1 %v3939_v30  ;;  %v4009_v30 = vld [vmem:[%s5835_s1 + $0x57c] ss:$20 sps:$4 sm:$0xff]   ;;  %v4051_v59 = vld [vmem:[%s5835_s1 + $0x694] ss:$20 sps:$4 sm:$0xff]  }
  0x20   :  { %2215 = vmatpush1.bf16.msra.mxu0 %v3940_v31  ;;  %2175 = vmatprep.subr.bf16.mxu1 %v3941_v32  ;;  %v4012_v31 = vld [vmem:[%s5835_s1 + $0x84] ss:$20 sps:$4 sm:$0xff]  }
  0x21   :  { %2216 = vmatprep.subr.bf16.mxu0 %v3943_v33  ;;  %v4007_v32 = vld [vmem:[%s5835_s1 + $0x578] ss:$20 sps:$4 sm:$0xff]   ;;  %v4010_v33 = vld [vmem:[%s5835_s1 + $0x80] ss:$20 sps:$4 sm:$0xff]  }
  0x23   :  { %2176 = vmatpush1.bf16.msra.mxu1 %v3945_v34  ;;  %v4015_v34 = vld [vmem:[%s5835_s1 + $0x5a4] ss:$20 sps:$4 sm:$0xff]  }
  0x24   :  { %2217 = vmatpush1.bf16.msra.mxu0 %v3946_v35  ;;  %2177 = vmatprep.subr.bf16.mxu1 %v3947_v39  ;;  %v4018_v35 = vld [vmem:[%s5835_s1 + $0xac] ss:$20 sps:$4 sm:$0xff]   ;;  %v4024_v39 = vld [vmem:[%s5835_s1 + $0xd4] ss:$20 sps:$4 sm:$0xff]  }
  0x25   :  { %2218 = vmatprep.subr.bf16.mxu0 %v3949_v40  ;;  %v4019_v40 = vld [vmem:[%s5835_s1 + $0x5c8] ss:$20 sps:$4 sm:$0xff]  }
  0x27   :  { %2178 = vmatpush1.bf16.msra.mxu1 %v3951_v41  ;;  %v4022_v41 = vld [vmem:[%s5835_s1 + $0xd0] ss:$20 sps:$4 sm:$0xff]  }
  0x28   :  { %2219 = vmatpush1.bf16.msra.mxu0 %v3952_v44  ;;  %2179 = vmatprep.subr.bf16.mxu1 %v3953_v45  ;;  %v4030_v44 = vld [vmem:[%s5835_s1 + $0xfc] ss:$20 sps:$4 sm:$0xff]  }
  0x29   :  { %2220 = vmatprep.subr.bf16.mxu0 %v3955_v46  ;;  %v4025_v45 = vld [vmem:[%s5835_s1 + $0x5f0] ss:$20 sps:$4 sm:$0xff]   ;;  %v4028_v46 = vld [vmem:[%s5835_s1 + $0xf8] ss:$20 sps:$4 sm:$0xff]  }
  0x2b   :  { %2180 = vmatpush1.bf16.msra.mxu1 %v3957_v47  ;;  %v4033_v47 = vld [vmem:[%s5835_s1 + $0x61c] ss:$20 sps:$4 sm:$0xff]  }
  0x2c   :  { %2221 = vmatpush1.bf16.msra.mxu0 %v3958_v48  ;;  %2181 = vmatprep.subr.bf16.mxu1 %v3959_v50  ;;  %v4036_v48 = vld [vmem:[%s5835_s1 + $0x124] ss:$20 sps:$4 sm:$0xff]   ;;  %v4034_v50 = vld [vmem:[%s5835_s1 + $0x120] ss:$20 sps:$4 sm:$0xff]  }
  0x2d   :  { %2222 = vmatprep.subr.bf16.mxu0 %v3961_v51  ;;  %v4039_v51 = vld [vmem:[%s5835_s1 + $0x644] ss:$20 sps:$4 sm:$0xff]  }
  0x2f   :  { %2182 = vmatpush1.bf16.msra.mxu1 %v3963_v53  ;;  %v4037_v53 = vld [vmem:[%s5835_s1 + $0x640] ss:$20 sps:$4 sm:$0xff]  }
  0x30   :  { %2223 = vmatpush1.bf16.msra.mxu0 %v3964_v56  ;;  %2183 = vmatprep.subr.bf16.mxu1 %v3965_v57  ;;  %v4048_v56 = vld [vmem:[%s5835_s1 + $0x174] ss:$20 sps:$4 sm:$0xff]  }
  0x31   :  { %2224 = vmatprep.subr.bf16.mxu0 %v3967_v58  ;;  %v4043_v57 = vld [vmem:[%s5835_s1 + $0x668] ss:$20 sps:$4 sm:$0xff]   ;;  %v4046_v58 = vld [vmem:[%s5835_s1 + $0x170] ss:$20 sps:$4 sm:$0xff]  }
  0x33   :  { %2184 = vmatpush1.bf16.msra.mxu1 %v3969_v61  ;;  %v4049_v61 = vld [vmem:[%s5835_s1 + $0x690] ss:$20 sps:$4 sm:$0xff]  }
  0x34   :  { %2225 = vmatpush1.bf16.msra.mxu0 %v3970_v0  ;;  %2185 = vmatprep.subr.bf16.mxu1 %v3971_v1  ;;  %v4052_v0 = vld [vmem:[%s5835_s1 + $0x198] ss:$20 sps:$4 sm:$0xff]   ;;  %v4057_v1 = vld [vmem:[%s5835_s1 + $0x6bc] ss:$20 sps:$4 sm:$0xff]  }
  0x35   :  { %2226 = vmatprep.subr.bf16.mxu0 %v3973_v2  ;;  %v4060_v2 = vld [vmem:[%s5835_s1 + $0x1c4] ss:$20 sps:$4 sm:$0xff]  }
  0x37   :  { %2186 = vmatpush1.bf16.msra.mxu1 %v3975_v4  ;;  %v4055_v4 = vld [vmem:[%s5835_s1 + $0x6b8] ss:$20 sps:$4 sm:$0xff]  }
  0x38   :  { %2227 = vmatpush1.bf16.msra.mxu0 %v3976_v5  ;;  %2187 = vmatprep.subr.bf16.mxu1 %v3977_v6  ;;  %v4058_v5 = vld [vmem:[%s5835_s1 + $0x1c0] ss:$20 sps:$4 sm:$0xff]   ;;  %v4063_v6 = vld [vmem:[%s5835_s1 + $0x6e4] ss:$20 sps:$4 sm:$0xff]  }
  0x39   :  { %2228 = vmatprep.subr.bf16.mxu0 %v3979_v7  ;;  %v4066_v7 = vld [vmem:[%s5835_s1 + $0x1ec] ss:$20 sps:$4 sm:$0xff]  }
  0x3b   :  { %2188 = vmatpush1.bf16.msra.mxu1 %v3981_v8  ;;  %v4061_v8 = vld [vmem:[%s5835_s1 + $0x6e0] ss:$20 sps:$4 sm:$0xff]  }
  0x3c   :  { %2229 = vmatpush1.bf16.msra.mxu0 %v3982_v9  ;;  %2189 = vmatprep.subr.bf16.mxu1 %v3983_v10  ;;  %v4064_v9 = vld [vmem:[%s5835_s1 + $0x1e8] ss:$20 sps:$4 sm:$0xff]   ;;  %v4069_v10 = vld [vmem:[%s5835_s1 + $0x70c] ss:$20 sps:$4 sm:$0xff]  }
  0x3d   :  { %2230 = vmatprep.subr.bf16.mxu0 %v3985_v11  ;;  %v4072_v11 = vld [vmem:[%s5835_s1 + $0x214] ss:$20 sps:$4 sm:$0xff]  }
  0x3f   :  { %2190 = vmatpush1.bf16.msra.mxu1 %v3987_v12  ;;  %v4067_v12 = vld [vmem:[%s5835_s1 + $0x708] ss:$20 sps:$4 sm:$0xff]  }
  0x40   :  { %2231 = vmatpush1.bf16.msra.mxu0 %v3988_v14  ;;  %2323 = vmatprep.subr.bf16.mxu1 %v3994_v16  ;;  %v4070_v14 = vld [vmem:[%s5835_s1 + $0x210] ss:$20 sps:$4 sm:$0xff]  }
  0x41   :  { %2241 = vmatprep.subr.bf16.mxu0 %v3991_v15  ;;  %v4075_v15 = vld [vmem:[%s5835_s1 + $0x734] ss:$20 sps:$4 sm:$0xff]   ;;  %v4078_v16 = vld [vmem:[%s5835_s1 + $0x23c] ss:$20 sps:$4 sm:$0xff]  }
  0x42   :  { %2192 = vmatmul.mubr.bf16.vlgmr.msra.gmra.mrb[0].mxu1 %v4737_v13 }
  0x43   :  { %2233 = vmatmul.mubr.bf16.vlgmr.msra.gmra.mrb[0].mxu0 %v4753_v19  ;;  %2324 = vmatpush1.bf16.msra.mxu1 %v3992_v20  ;;  %v4081_v20 = vld [vmem:[%s5835_s1 + $0x75c] ss:$20 sps:$4 sm:$0xff]  }
  0x44   :  { %2242 = vmatpush1.bf16.msra.mxu0 %v3989_v18  ;;  %2325 = vmatprep.subr.bf16.mxu1 %v4000_v22  ;;  %v4076_v18 = vld [vmem:[%s5835_s1 + $0x238] ss:$20 sps:$4 sm:$0xff]  }
  0x45   :  { %2243 = vmatprep.subr.bf16.mxu0 %v3997_v21  ;;  %2273 = vmatprep.mubr.bf16.mxu0 %v4765_v23  ;;  %v4084_v21 = vld [vmem:[%s5835_s1 + $0x264] ss:$20 sps:$4 sm:$0xff]  }
  0x46   :  { %2355 = vmatprep.mubr.bf16.mxu1 %v4689_v62  ;;  %v4079_v22 = vld [vmem:[%s5835_s1 + $0x758] ss:$20 sps:$4 sm:$0xff]  }
  0x47   :  { %2326 = vmatpush1.bf16.msra.mxu1 %v3998_v25  ;;  %v4088_v25 = vld [vmem:[%s5835_s1 + $0x784] ss:$20 sps:$4 sm:$0xff]  }
  0x48   :  { %2244 = vmatpush1.bf16.msra.mxu0 %v3995_v24  ;;  %2327 = vmatprep.subr.bf16.mxu1 %v4006_v27  ;;  %v4082_v24 = vld [vmem:[%s5835_s1 + $0x260] ss:$20 sps:$4 sm:$0xff]  }
  0x49   :  { %2245 = vmatprep.subr.bf16.mxu0 %v4003_v26  ;;  %v4091_v26 = vld [vmem:[%s5835_s1 + $0x28c] ss:$20 sps:$4 sm:$0xff]  }
  0x4a   :  { %v4086_v27 = vld [vmem:[%s5835_s1 + $0x780] ss:$20 sps:$4 sm:$0xff]  }
  0x4b   :  { %2328 = vmatpush1.bf16.msra.mxu1 %v4004_v29  ;;  %v4094_v29 = vld [vmem:[%s5835_s1 + $0x7ac] ss:$20 sps:$4 sm:$0xff]  }
  0x4c   :  { %2246 = vmatpush1.bf16.msra.mxu0 %v4001_v28  ;;  %2329 = vmatprep.subr.bf16.mxu1 %v4012_v31  ;;  %v4089_v28 = vld [vmem:[%s5835_s1 + $0x288] ss:$20 sps:$4 sm:$0xff]   ;;  %v4965_v31 = vcombine.high %v4765_v23, %v4765_v23 }
  0x4d   :  { %2247 = vmatprep.subr.bf16.mxu0 %v4009_v30  ;;  %v4097_v30 = vld [vmem:[%s5835_s1 + $0x2b4] ss:$20 sps:$4 sm:$0xff]  }
  0x4f   :  { %2330 = vmatpush1.bf16.msra.mxu1 %v4010_v33  ;;  %v4095_v33 = vld [vmem:[%s5835_s1 + $0x2b0] ss:$20 sps:$4 sm:$0xff]  }
  0x50   :  { %2248 = vmatpush1.bf16.msra.mxu0 %v4007_v32  ;;  %2331 = vmatprep.subr.bf16.mxu1 %v4018_v35  ;;  %v4092_v32 = vld [vmem:[%s5835_s1 + $0x7a8] ss:$20 sps:$4 sm:$0xff]  }
  0x51   :  { %2249 = vmatprep.subr.bf16.mxu0 %v4015_v34  ;;  %v4100_v34 = vld [vmem:[%s5835_s1 + $0x7d4] ss:$20 sps:$4 sm:$0xff]   ;;  %v4103_v35 = vld [vmem:[%s5835_s1 + $0x2dc] ss:$20 sps:$4 sm:$0xff]  }
  0x53   :  { %2332 = vmatpush1.bf16.msra.mxu1 %v4016_v37  ;;  %v4101_v37 = vld [vmem:[%s5835_s1 + $0x2d8] ss:$20 sps:$4 sm:$0xff]  }
  0x54   :  { %2250 = vmatpush1.bf16.msra.mxu0 %v4013_v36  ;;  %2333 = vmatprep.subr.bf16.mxu1 %v4024_v39  ;;  %v4098_v36 = vld [vmem:[%s5835_s1 + $0x7d0] ss:$20 sps:$4 sm:$0xff]  }
  0x55   :  { %2251 = vmatprep.subr.bf16.mxu0 %v4021_v38  ;;  %v4106_v38 = vld [vmem:[%s5835_s1 + $0x7fc] ss:$20 sps:$4 sm:$0xff]   ;;  %v4109_v39 = vld [vmem:[%s5835_s1 + $0x304] ss:$20 sps:$4 sm:$0xff]  }
  0x57   :  { %2334 = vmatpush1.bf16.msra.mxu1 %v4022_v41  ;;  %v4107_v41 = vld [vmem:[%s5835_s1 + $0x300] ss:$20 sps:$4 sm:$0xff]  }
  0x58   :  { %2252 = vmatpush1.bf16.msra.mxu0 %v4019_v40  ;;  %2335 = vmatprep.subr.bf16.mxu1 %v4030_v44  ;;  %v4104_v40 = vld [vmem:[%s5835_s1 + $0x7f8] ss:$20 sps:$4 sm:$0xff]  }
  0x59   :  { %2253 = vmatprep.subr.bf16.mxu0 %v4027_v43  ;;  %v4112_v43 = vld [vmem:[%s5835_s1 + $0x824] ss:$20 sps:$4 sm:$0xff]   ;;  %v4115_v44 = vld [vmem:[%s5835_s1 + $0x32c] ss:$20 sps:$4 sm:$0xff]  }
  0x5b   :  { %2336 = vmatpush1.bf16.msra.mxu1 %v4028_v46  ;;  %v4113_v46 = vld [vmem:[%s5835_s1 + $0x328] ss:$20 sps:$4 sm:$0xff]  }
  0x5c   :  { %2254 = vmatpush1.bf16.msra.mxu0 %v4025_v45  ;;  %2337 = vmatprep.subr.bf16.mxu1 %v4036_v48  ;;  %v4110_v45 = vld [vmem:[%s5835_s1 + $0x820] ss:$20 sps:$4 sm:$0xff]  }
  0x5d   :  { %2255 = vmatprep.subr.bf16.mxu0 %v4033_v47  ;;  %v4118_v47 = vld [vmem:[%s5835_s1 + $0x84c] ss:$20 sps:$4 sm:$0xff]   ;;  %v4121_v48 = vld [vmem:[%s5835_s1 + $0x354] ss:$20 sps:$4 sm:$0xff]  }
  0x5f   :  { %2338 = vmatpush1.bf16.msra.mxu1 %v4034_v50  ;;  %v4119_v50 = vld [vmem:[%s5835_s1 + $0x350] ss:$20 sps:$4 sm:$0xff]  }
  0x60   :  { %2256 = vmatpush1.bf16.msra.mxu0 %v4031_v49  ;;  %2339 = vmatprep.subr.bf16.mxu1 %v4042_v52  ;;  %v4116_v49 = vld [vmem:[%s5835_s1 + $0x848] ss:$20 sps:$4 sm:$0xff]  }
  0x61   :  { %2257 = vmatprep.subr.bf16.mxu0 %v4039_v51  ;;  %v4124_v51 = vld [vmem:[%s5835_s1 + $0x874] ss:$20 sps:$4 sm:$0xff]   ;;  %v4127_v52 = vld [vmem:[%s5835_s1 + $0x37c] ss:$20 sps:$4 sm:$0xff]  }
  0x63   :  { %2340 = vmatpush1.bf16.msra.mxu1 %v4040_v54  ;;  %v4125_v54 = vld [vmem:[%s5835_s1 + $0x378] ss:$20 sps:$4 sm:$0xff]  }
  0x64   :  { %2258 = vmatpush1.bf16.msra.mxu0 %v4037_v53  ;;  %2341 = vmatprep.subr.bf16.mxu1 %v4048_v56  ;;  %v4122_v53 = vld [vmem:[%s5835_s1 + $0x870] ss:$20 sps:$4 sm:$0xff]  }
  0x65   :  { %2259 = vmatprep.subr.bf16.mxu0 %v4045_v55  ;;  %v4130_v55 = vld [vmem:[%s5835_s1 + $0x89c] ss:$20 sps:$4 sm:$0xff]   ;;  %v4133_v56 = vld [vmem:[%s5835_s1 + $0x3a4] ss:$20 sps:$4 sm:$0xff]  }
  0x67   :  { %2342 = vmatpush1.bf16.msra.mxu1 %v4046_v58  ;;  %v4131_v58 = vld [vmem:[%s5835_s1 + $0x3a0] ss:$20 sps:$4 sm:$0xff]  }
  0x68   :  { %2260 = vmatpush1.bf16.msra.mxu0 %v4043_v57  ;;  %2343 = vmatprep.subr.bf16.mxu1 %v4054_v60  ;;  %v4128_v57 = vld [vmem:[%s5835_s1 + $0x898] ss:$20 sps:$4 sm:$0xff]  }
  0x69   :  { %2261 = vmatprep.subr.bf16.mxu0 %v4051_v59  ;;  %v4136_v59 = vld [vmem:[%s5835_s1 + $0x8c4] ss:$20 sps:$4 sm:$0xff]   ;;  %v4139_v60 = vld [vmem:[%s5835_s1 + $0x3cc] ss:$20 sps:$4 sm:$0xff]  }
  0x6b   :  { %2344 = vmatpush1.bf16.msra.mxu1 %v4052_v0  ;;  %v4137_v0 = vld [vmem:[%s5835_s1 + $0x3c8] ss:$20 sps:$4 sm:$0xff]  }
  0x6c   :  { %2262 = vmatpush1.bf16.msra.mxu0 %v4049_v61  ;;  %2345 = vmatprep.subr.bf16.mxu1 %v4060_v2  ;;  %v4134_v61 = vld [vmem:[%s5835_s1 + $0x8c0] ss:$20 sps:$4 sm:$0xff]  }
  0x6d   :  { %2263 = vmatprep.subr.bf16.mxu0 %v4057_v1  ;;  %v4142_v1 = vld [vmem:[%s5835_s1 + $0x8ec] ss:$20 sps:$4 sm:$0xff]   ;;  %v4145_v2 = vld [vmem:[%s5835_s1 + $0x3f4] ss:$20 sps:$4 sm:$0xff]  }
  0x6f   :  { %2346 = vmatpush1.bf16.msra.mxu1 %v4058_v5  ;;  %v4143_v5 = vld [vmem:[%s5835_s1 + $0x3f0] ss:$20 sps:$4 sm:$0xff]  }
  0x70   :  { %2264 = vmatpush1.bf16.msra.mxu0 %v4055_v4  ;;  %2347 = vmatprep.subr.bf16.mxu1 %v4066_v7  ;;  %v4140_v4 = vld [vmem:[%s5835_s1 + $0x8e8] ss:$20 sps:$4 sm:$0xff]  }
  0x71   :  { %2265 = vmatprep.subr.bf16.mxu0 %v4063_v6  ;;  %v4148_v6 = vld [vmem:[%s5835_s1 + $0x914] ss:$20 sps:$4 sm:$0xff]   ;;  %v4151_v7 = vld [vmem:[%s5835_s1 + $0x41c] ss:$20 sps:$4 sm:$0xff]  }
  0x73   :  { %2348 = vmatpush1.bf16.msra.mxu1 %v4064_v9  ;;  %v4149_v9 = vld [vmem:[%s5835_s1 + $0x418] ss:$20 sps:$4 sm:$0xff]  }
  0x74   :  { %2266 = vmatpush1.bf16.msra.mxu0 %v4061_v8  ;;  %2349 = vmatprep.subr.bf16.mxu1 %v4072_v11  ;;  %v4146_v8 = vld [vmem:[%s5835_s1 + $0x910] ss:$20 sps:$4 sm:$0xff]  }
  0x75   :  { %2267 = vmatprep.subr.bf16.mxu0 %v4069_v10  ;;  %v4154_v10 = vld [vmem:[%s5835_s1 + $0x93c] ss:$20 sps:$4 sm:$0xff]   ;;  %v4157_v11 = vld [vmem:[%s5835_s1 + $0x444] ss:$20 sps:$4 sm:$0xff]  }
  0x77   :  { %2350 = vmatpush1.bf16.msra.mxu1 %v4070_v14  ;;  %v4155_v14 = vld [vmem:[%s5835_s1 + $0x440] ss:$20 sps:$4 sm:$0xff]  }
  0x78   :  { %2268 = vmatpush1.bf16.msra.mxu0 %v4067_v12  ;;  %2351 = vmatprep.subr.bf16.mxu1 %v4078_v16  ;;  %v4152_v12 = vld [vmem:[%s5835_s1 + $0x938] ss:$20 sps:$4 sm:$0xff]  }
  0x79   :  { %2269 = vmatprep.subr.bf16.mxu0 %v4075_v15  ;;  %v4160_v15 = vld [vmem:[%s5835_s1 + $0x964] ss:$20 sps:$4 sm:$0xff]   ;;  %v4163_v16 = vld [vmem:[%s5835_s1 + $0x46c] ss:$20 sps:$4 sm:$0xff]  }
  0x7b   :  { %2352 = vmatpush1.bf16.msra.mxu1 %v4076_v18  ;;  %v4161_v18 = vld [vmem:[%s5835_s1 + $0x468] ss:$20 sps:$4 sm:$0xff]  }
  0x7c   :  { %2270 = vmatpush1.bf16.msra.mxu0 %v4073_v17  ;;  %2353 = vmatprep.subr.bf16.mxu1 %v4084_v21  ;;  %v4158_v17 = vld [vmem:[%s5835_s1 + $0x960] ss:$20 sps:$4 sm:$0xff]  }
  0x7d   :  { %2271 = vmatprep.subr.bf16.mxu0 %v4081_v20  ;;  %v4166_v20 = vld [vmem:[%s5835_s1 + $0x98c] ss:$20 sps:$4 sm:$0xff]   ;;  %v4169_v21 = vld [vmem:[%s5835_s1 + $0x494] ss:$20 sps:$4 sm:$0xff]  }
  0x7f   :  { %2354 = vmatpush1.bf16.msra.mxu1 %v4082_v24  ;;  %v4167_v24 = vld [vmem:[%s5835_s1 + $0x490] ss:$20 sps:$4 sm:$0xff]  }
  0x80   :  { %2272 = vmatpush1.bf16.msra.mxu0 %v4079_v22  ;;  %2364 = vmatprep.subr.bf16.mxu1 %v4091_v26  ;;  %v4164_v22 = vld [vmem:[%s5835_s1 + $0x988] ss:$20 sps:$4 sm:$0xff]  }
  0x81   :  { %2282 = vmatprep.subr.bf16.mxu0 %v4088_v25  ;;  %v4172_v25 = vld [vmem:[%s5835_s1 + $0x9b4] ss:$20 sps:$4 sm:$0xff]   ;;  %v4175_v26 = vld [vmem:[%s5835_s1 + $0x4bc] ss:$20 sps:$4 sm:$0xff]  }
  0x82   :  { %2356 = vmatmul.mubr.bf16.vlgmr.msra.gmra.mrb[4].mxu1 %v4737_v13 }
  0x83   :  { %2274 = vmatmul.mubr.bf16.vlgmr.msra.gmra.mrb[0].mxu0 %v4692_v63  ;;  %2365 = vmatpush1.bf16.msra.mxu1 %v4089_v28  ;;  %v4173_v28 = vld [vmem:[%s5835_s1 + $0x4b8] ss:$20 sps:$4 sm:$0xff]  }
  0x84   :  { %2283 = vmatpush1.bf16.msra.mxu0 %v4086_v27  ;;  %2366 = vmatprep.subr.bf16.mxu1 %v4097_v30  ;;  %v4170_v27 = vld [vmem:[%s5835_s1 + $0x9b0] ss:$20 sps:$4 sm:$0xff]  }
  0x85   :  { %2284 = vmatprep.subr.bf16.mxu0 %v4094_v29  ;;  %2314 = vmatprep.mubr.bf16.mxu0 %v4965_v31  ;;  %v4178_v29 = vld [vmem:[%s5835_s1 + $0x9dc] ss:$20 sps:$4 sm:$0xff]   ;;  %v4181_v30 = vld [vmem:[%s5835_s1 + $0x4e4] ss:$20 sps:$4 sm:$0xff]  }
  0x86   :  { %2396 = vmatprep.mubr.bf16.mxu1 %v4705_v3 }
  0x87   :  { %2367 = vmatpush1.bf16.msra.mxu1 %v4095_v33  ;;  %v4179_v33 = vld [vmem:[%s5835_s1 + $0x4e0] ss:$20 sps:$4 sm:$0xff]  }
  0x88   :  { %2285 = vmatpush1.bf16.msra.mxu0 %v4092_v32  ;;  %2368 = vmatprep.subr.bf16.mxu1 %v4103_v35  ;;  %v4176_v32 = vld [vmem:[%s5835_s1 + $0x9d8] ss:$20 sps:$4 sm:$0xff]   ;;  %v4257_v35 = vld [vmem:[%s5835_s1 + $0x150] ss:$20 sps:$4 sm:$0xff]  }
  0x89   :  { %2286 = vmatprep.subr.bf16.mxu0 %v4100_v34  ;;  %v4184_v34 = vld [vmem:[%s5835_s1 + $0x50c] ss:$20 sps:$4 sm:$0xff]  }
  0x8b   :  { %2369 = vmatpush1.bf16.msra.mxu1 %v4101_v37  ;;  %v4182_v37 = vld [vmem:[%s5835_s1 + $0x508] ss:$20 sps:$4 sm:$0xff]  }
  0x8c   :  { %2287 = vmatpush1.bf16.msra.mxu0 %v4098_v36  ;;  %2370 = vmatprep.subr.bf16.mxu1 %v4109_v39  ;;  %v5153_v36 = vcombine.high %v4692_v63, %v4692_v63  ;;  %v4258_v39 = vld [vmem:[%s5835_s1 + $0x10] ss:$20 sps:$4 sm:$0xff]  }
  0x8d   :  { %2288 = vmatprep.subr.bf16.mxu0 %v4106_v38  ;;  %v4187_v38 = vld [vmem:[%s5835_s1 + $0x534] ss:$20 sps:$4 sm:$0xff]  }
  0x8f   :  { %2371 = vmatpush1.bf16.msra.mxu1 %v4107_v41  ;;  %v4185_v41 = vld [vmem:[%s5835_s1 + $0x530] ss:$20 sps:$4 sm:$0xff]  }
  0x90   :  { %2289 = vmatpush1.bf16.msra.mxu0 %v4104_v40  ;;  %2372 = vmatprep.subr.bf16.mxu1 %v4115_v44  ;;  %v4262_v40 = vld [vmem:[%s5835_s1 + $0x178] ss:$20 sps:$4 sm:$0xff]  }
  0x91   :  { %2290 = vmatprep.subr.bf16.mxu0 %v4112_v43  ;;  %v4190_v43 = vld [vmem:[%s5835_s1 + $0x55c] ss:$20 sps:$4 sm:$0xff]   ;;  %v4263_v44 = vld [vmem:[%s5835_s1 + $0x38] ss:$20 sps:$4 sm:$0xff]  }
  0x93   :  { %2373 = vmatpush1.bf16.msra.mxu1 %v4113_v46  ;;  %v4188_v46 = vld [vmem:[%s5835_s1 + $0x558] ss:$20 sps:$4 sm:$0xff]  }
  0x94   :  { %2291 = vmatpush1.bf16.msra.mxu0 %v4110_v45  ;;  %2374 = vmatprep.subr.bf16.mxu1 %v4121_v48  ;;  %v4267_v45 = vld [vmem:[%s5835_s1 + $0x1a0] ss:$20 sps:$4 sm:$0xff]  }
  0x95   :  { %2292 = vmatprep.subr.bf16.mxu0 %v4118_v47  ;;  %v4193_v47 = vld [vmem:[%s5835_s1 + $0x584] ss:$20 sps:$4 sm:$0xff]   ;;  %v4268_v48 = vld [vmem:[%s5835_s1 + $0x60] ss:$20 sps:$4 sm:$0xff]  }
  0x97   :  { %2375 = vmatpush1.bf16.msra.mxu1 %v4119_v50  ;;  %v4196_v50 = vld [vmem:[%s5835_s1 + $0x5ac] ss:$20 sps:$4 sm:$0xff]  }
  0x98   :  { %2293 = vmatpush1.bf16.msra.mxu0 %v4116_v49  ;;  %2376 = vmatprep.subr.bf16.mxu1 %v4127_v52  ;;  %v4272_v49 = vld [vmem:[%s5835_s1 + $0x1c8] ss:$20 sps:$4 sm:$0xff]   ;;  %v4277_v52 = vld [vmem:[%s5835_s1 + $0x1f0] ss:$20 sps:$4 sm:$0xff]  }
  0x99   :  { %2294 = vmatprep.subr.bf16.mxu0 %v4124_v51  ;;  %v4273_v51 = vld [vmem:[%s5835_s1 + $0x88] ss:$20 sps:$4 sm:$0xff]  }
  0x9b   :  { %2377 = vmatpush1.bf16.msra.mxu1 %v4125_v54  ;;  %v4199_v54 = vld [vmem:[%s5835_s1 + $0x5d4] ss:$20 sps:$4 sm:$0xff]  }
  0x9c   :  { %2295 = vmatpush1.bf16.msra.mxu0 %v4122_v53  ;;  %2378 = vmatprep.subr.bf16.mxu1 %v4133_v56  ;;  %v4194_v53 = vld [vmem:[%s5835_s1 + $0x5a8] ss:$20 sps:$4 sm:$0xff]   ;;  %v4282_v56 = vld [vmem:[%s5835_s1 + $0x218] ss:$20 sps:$4 sm:$0xff]  }
  0x9d   :  { %2296 = vmatprep.subr.bf16.mxu0 %v4130_v55  ;;  %v4278_v55 = vld [vmem:[%s5835_s1 + $0xb0] ss:$20 sps:$4 sm:$0xff]  }
  0x9f   :  { %2379 = vmatpush1.bf16.msra.mxu1 %v4131_v58  ;;  %v4202_v58 = vld [vmem:[%s5835_s1 + $0x5fc] ss:$20 sps:$4 sm:$0xff]  }
  0xa0   :  { %2297 = vmatpush1.bf16.msra.mxu0 %v4128_v57  ;;  %2380 = vmatprep.subr.bf16.mxu1 %v4139_v60  ;;  %v4197_v57 = vld [vmem:[%s5835_s1 + $0x5d0] ss:$20 sps:$4 sm:$0xff]   ;;  %v4287_v60 = vld [vmem:[%s5835_s1 + $0x240] ss:$20 sps:$4 sm:$0xff]  }
  0xa1   :  { %2298 = vmatprep.subr.bf16.mxu0 %v4136_v59  ;;  %v4283_v59 = vld [vmem:[%s5835_s1 + $0xd8] ss:$20 sps:$4 sm:$0xff]  }
  0xa3   :  { %2381 = vmatpush1.bf16.msra.mxu1 %v4137_v0  ;;  %v4205_v0 = vld [vmem:[%s5835_s1 + $0x624] ss:$20 sps:$4 sm:$0xff]  }
  0xa4   :  { %2299 = vmatpush1.bf16.msra.mxu0 %v4134_v61  ;;  %2382 = vmatprep.subr.bf16.mxu1 %v4145_v2  ;;  %v4200_v61 = vld [vmem:[%s5835_s1 + $0x5f8] ss:$20 sps:$4 sm:$0xff]   ;;  %v4292_v2 = vld [vmem:[%s5835_s1 + $0x268] ss:$20 sps:$4 sm:$0xff]  }
  0xa5   :  { %2300 = vmatprep.subr.bf16.mxu0 %v4142_v1  ;;  %v4288_v1 = vld [vmem:[%s5835_s1 + $0x100] ss:$20 sps:$4 sm:$0xff]  }
  0xa7   :  { %2383 = vmatpush1.bf16.msra.mxu1 %v4143_v5  ;;  %v4208_v5 = vld [vmem:[%s5835_s1 + $0x64c] ss:$20 sps:$4 sm:$0xff]  }
  0xa8   :  { %2301 = vmatpush1.bf16.msra.mxu0 %v4140_v4  ;;  %2384 = vmatprep.subr.bf16.mxu1 %v4151_v7  ;;  %v4203_v4 = vld [vmem:[%s5835_s1 + $0x620] ss:$20 sps:$4 sm:$0xff]   ;;  %v4296_v7 = vld [vmem:[%s5835_s1 + $0x650] ss:$20 sps:$4 sm:$0xff]  }
  0xa9   :  { %2302 = vmatprep.subr.bf16.mxu0 %v4148_v6  ;;  %v4293_v6 = vld [vmem:[%s5835_s1 + $0x128] ss:$20 sps:$4 sm:$0xff]  }
  0xab   :  { %2385 = vmatpush1.bf16.msra.mxu1 %v4149_v9  ;;  %v4211_v9 = vld [vmem:[%s5835_s1 + $0x674] ss:$20 sps:$4 sm:$0xff]  }
  0xac   :  { %2303 = vmatpush1.bf16.msra.mxu0 %v4146_v8  ;;  %2386 = vmatprep.subr.bf16.mxu1 %v4157_v11  ;;  %v4206_v8 = vld [vmem:[%s5835_s1 + $0x648] ss:$20 sps:$4 sm:$0xff]   ;;  %v4209_v11 = vld [vmem:[%s5835_s1 + $0x670] ss:$20 sps:$4 sm:$0xff]  }
  0xad   :  { %2304 = vmatprep.subr.bf16.mxu0 %v4154_v10  ;;  %v4297_v10 = vld [vmem:[%s5835_s1 + $0x510] ss:$20 sps:$4 sm:$0xff]  }
  0xaf   :  { %2387 = vmatpush1.bf16.msra.mxu1 %v4155_v14  ;;  %v4214_v14 = vld [vmem:[%s5835_s1 + $0x69c] ss:$20 sps:$4 sm:$0xff]  }
  0xb0   :  { %2305 = vmatpush1.bf16.msra.mxu0 %v4152_v12  ;;  %2388 = vmatprep.subr.bf16.mxu1 %v4163_v16  ;;  %v4300_v12 = vld [vmem:[%s5835_s1 + $0x678] ss:$20 sps:$4 sm:$0xff]   ;;  %v4304_v16 = vld [vmem:[%s5835_s1 + $0x6a0] ss:$20 sps:$4 sm:$0xff]  }
  0xb1   :  { %2306 = vmatprep.subr.bf16.mxu0 %v4160_v15  ;;  %v4301_v15 = vld [vmem:[%s5835_s1 + $0x538] ss:$20 sps:$4 sm:$0xff]  }
  0xb3   :  { %2389 = vmatpush1.bf16.msra.mxu1 %v4161_v18  ;;  %v4305_v18 = vld [vmem:[%s5835_s1 + $0x560] ss:$20 sps:$4 sm:$0xff]  }
  0xb4   :  { %2307 = vmatpush1.bf16.msra.mxu0 %v4158_v17  ;;  %2390 = vmatprep.subr.bf16.mxu1 %v4169_v21  ;;  %v4212_v17 = vld [vmem:[%s5835_s1 + $0x698] ss:$20 sps:$4 sm:$0xff]  }
  0xb5   :  { %2308 = vmatprep.subr.bf16.mxu0 %v4166_v20  ;;  %v4308_v20 = vld [vmem:[%s5835_s1 + $0x6c8] ss:$20 sps:$4 sm:$0xff]   ;;  %v4220_v21 = vld [vmem:[%s5835_s1 + $0x6ec] ss:$20 sps:$4 sm:$0xff]  }
  0xb7   :  { %2391 = vmatpush1.bf16.msra.mxu1 %v4167_v24  ;;  %v4312_v24 = vld [vmem:[%s5835_s1 + $0x6f0] ss:$20 sps:$4 sm:$0xff]  }
  0xb8   :  { %2309 = vmatpush1.bf16.msra.mxu0 %v4164_v22  ;;  %2392 = vmatprep.subr.bf16.mxu1 %v4175_v26  ;;  %v4309_v22 = vld [vmem:[%s5835_s1 + $0x588] ss:$20 sps:$4 sm:$0xff]  }
  0xb9   :  { %2310 = vmatprep.subr.bf16.mxu0 %v4172_v25  ;;  %v4218_v25 = vld [vmem:[%s5835_s1 + $0x6e8] ss:$20 sps:$4 sm:$0xff]  }
  0xba   :  { %v4223_v26 = vld [vmem:[%s5835_s1 + $0x714] ss:$20 sps:$4 sm:$0xff]  }
  0xbb   :  { %2393 = vmatpush1.bf16.msra.mxu1 %v4173_v28  ;;  %v4316_v28 = vld [vmem:[%s5835_s1 + $0x718] ss:$20 sps:$4 sm:$0xff]  }
  0xbc   :  { %2311 = vmatpush1.bf16.msra.mxu0 %v4170_v27  ;;  %2394 = vmatprep.subr.bf16.mxu1 %v4181_v30  ;;  %v4313_v27 = vld [vmem:[%s5835_s1 + $0x5b0] ss:$20 sps:$4 sm:$0xff]  }
  0xbd   :  { %2312 = vmatprep.subr.bf16.mxu0 %v4178_v29  ;;  %v4221_v29 = vld [vmem:[%s5835_s1 + $0x710] ss:$20 sps:$4 sm:$0xff]  }
  0xbe   :  { %v4226_v30 = vld [vmem:[%s5835_s1 + $0x73c] ss:$20 sps:$4 sm:$0xff]  }
  0xbf   :  { %2395 = vmatpush1.bf16.msra.mxu1 %v4179_v33  ;;  %v4320_v33 = vld [vmem:[%s5835_s1 + $0x740] ss:$20 sps:$4 sm:$0xff]  }
  0xc0   :  { %2313 = vmatpush1.bf16.msra.mxu0 %v4176_v32  ;;  %2405 = vmatprep.subr.bf16.mxu1 %v4184_v34  ;;  %v4317_v32 = vld [vmem:[%s5835_s1 + $0x5d8] ss:$20 sps:$4 sm:$0xff]  }
  0xc1   :  { %3766 = vmatprep.subr.bf16.mxu0 %v4257_v35  ;;  %v4224_v34 = vld [vmem:[%s5835_s1 + $0x738] ss:$20 sps:$4 sm:$0xff]  }
  0xc2   :  { %2397 = vmatmul.mubr.bf16.vlgmr.msra.gmra.mrb[4].mxu1 %v4753_v19  ;;  %v4229_v35 = vld [vmem:[%s5835_s1 + $0x764] ss:$20 sps:$4 sm:$0xff]  }
  0xc3   :  { %2315 = vmatmul.mubr.bf16.vlgmr.msra.gmra.mrb[0].mxu0 %v5153_v36  ;;  %2406 = vmatpush1.bf16.msra.mxu1 %v4182_v37  ;;  %v4321_v37 = vld [vmem:[%s5835_s1 + $0x600] ss:$20 sps:$4 sm:$0xff]  }
  0xc4   :  { %2437 = vmatprep.mubr.bf16.mxu1 %v4765_v23  ;;  %2407 = vmatprep.subr.bf16.mxu1 %v4187_v38  ;;  %v4324_v38 = vld [vmem:[%s5835_s1 + $0x768] ss:$20 sps:$4 sm:$0xff]  }
  0xc5   :  { %3767 = vmatpush3.bf16.msra.mxu0 %v4258_v39  ;;  %2519 = vmatprep.mubr.bf16.mxu0 %v4689_v62  ;;  %v4191_v62 = vld [vmem:[%s5835_s1 + $0x580] ss:$20 sps:$4 sm:$0xff]  }
  0xc6   :  { %3768 = vmatprep.subr.bf16.mxu0 %v4262_v40  ;;  %v4227_v39 = vld [vmem:[%s5835_s1 + $0x760] ss:$20 sps:$4 sm:$0xff]  }
  0xc7   :  { %2408 = vmatpush1.bf16.msra.mxu1 %v4185_v41  ;;  %v4232_v40 = vld [vmem:[%s5835_s1 + $0x78c] ss:$20 sps:$4 sm:$0xff]   ;;  %v4325_v41 = vld [vmem:[%s5835_s1 + $0x628] ss:$20 sps:$4 sm:$0xff]  }
  0xc8   :  { %2409 = vmatprep.subr.bf16.mxu1 %v4190_v43  ;;  %v4335_v43 = vld [vmem:[%s5837_s3 + $0x4] ss:$8 sps:$4 sm:$0xff]  }
  0xc9   :  { %3769 = vmatpush3.bf16.msra.mxu0 %v4263_v44  ;;  %v4230_v44 = vld [vmem:[%s5835_s1 + $0x788] ss:$20 sps:$4 sm:$0xff]  }
  0xca   :  { %3770 = vmatprep.subr.bf16.mxu0 %v4267_v45  ;;  %v4235_v45 = vld [vmem:[%s5835_s1 + $0x7b4] ss:$20 sps:$4 sm:$0xff]  }
  0xcb   :  { %2410 = vmatpush1.bf16.msra.mxu1 %v4188_v46  ;;  %v4333_v46 = vld [vmem:[%s5837_s3] ss:$8 sps:$4 sm:$0xff]  }
  0xcc   :  { %2411 = vmatprep.subr.bf16.mxu1 %v4193_v47  ;;  %v4340_v47 = vld [vmem:[%s5837_s3 + $0x14] ss:$8 sps:$4 sm:$0xff]  }
  0xcd   :  { %3771 = vmatpush3.bf16.msra.mxu0 %v4268_v48  ;;  %v4233_v48 = vld [vmem:[%s5835_s1 + $0x7b0] ss:$20 sps:$4 sm:$0xff]  }
  0xce   :  { %3772 = vmatprep.subr.bf16.mxu0 %v4272_v49  ;;  %v4238_v49 = vld [vmem:[%s5835_s1 + $0x7dc] ss:$20 sps:$4 sm:$0xff]  }
  0xcf   :  { %2412 = vmatpush1.bf16.msra.mxu1 %v4191_v62  ;;  %v4338_v62 = vld [vmem:[%s5837_s3 + $0x10] ss:$8 sps:$4 sm:$0xff]  }
  0xd0   :  { %2413 = vmatprep.subr.bf16.mxu1 %v4196_v50  ;;  %v4345_v50 = vld [vmem:[%s5837_s3 + $0x24] ss:$8 sps:$4 sm:$0xff]  }
  0xd1   :  { %3773 = vmatpush3.bf16.msra.mxu0 %v4273_v51  ;;  %v4236_v51 = vld [vmem:[%s5835_s1 + $0x7d8] ss:$20 sps:$4 sm:$0xff]  }
  0xd2   :  { %3774 = vmatprep.subr.bf16.mxu0 %v4277_v52  ;;  %v4241_v52 = vld [vmem:[%s5835_s1 + $0x804] ss:$20 sps:$4 sm:$0xff]  }
  0xd3   :  { %2414 = vmatpush1.bf16.msra.mxu1 %v4194_v53  ;;  %v4350_v53 = vld [vmem:[%s5837_s3 + $0x34] ss:$8 sps:$4 sm:$0xff]  }
  0xd4   :  { %2415 = vmatprep.subr.bf16.mxu1 %v4199_v54  ;;  %v4239_v54 = vld [vmem:[%s5835_s1 + $0x800] ss:$20 sps:$4 sm:$0xff]  }
  0xd5   :  { %3775 = vmatpush3.bf16.msra.mxu0 %v4278_v55  ;;  %v4244_v55 = vld [vmem:[%s5835_s1 + $0x82c] ss:$20 sps:$4 sm:$0xff]  }
  0xd6   :  { %3776 = vmatprep.subr.bf16.mxu0 %v4282_v56 }
  0xd7   :  { %2416 = vmatpush1.bf16.msra.mxu1 %v4197_v57 }
  0xd8   :  { %2417 = vmatprep.subr.bf16.mxu1 %v4202_v58 }
  0xd9   :  { %3777 = vmatpush3.bf16.msra.mxu0 %v4283_v59 }
  0xda   :  { %3778 = vmatprep.subr.bf16.mxu0 %v4287_v60 }
  0xdb   :  { %2418 = vmatpush1.bf16.msra.mxu1 %v4200_v61 }
  0xdc   :  { %2419 = vmatprep.subr.bf16.mxu1 %v4205_v0 }
  0xdd   :  { %3779 = vmatpush3.bf16.msra.mxu0 %v4288_v1 }
  0xde   :  { %3780 = vmatprep.subr.bf16.mxu0 %v4292_v2 }
  0xdf   :  { %2420 = vmatpush1.bf16.msra.mxu1 %v4203_v4 }
  0xe0   :  { %2421 = vmatprep.subr.bf16.mxu1 %v4208_v5 }
  0xe1   :  { %3781 = vmatpush3.bf16.msra.mxu0 %v4293_v6 }
  0xe2   :  { %3810 = vmatprep.subr.bf16.mxu0 %v4296_v7 }
  0xe3   :  { %2422 = vmatpush1.bf16.msra.mxu1 %v4206_v8 }
  0xe4   :  { %2520 = vmatmul.mubr.bf16.vlgmr.msra.gmra.mrb[4].mxu0 %v4737_v13  ;;  %2423 = vmatprep.subr.bf16.mxu1 %v4211_v9  ;;  %v4217_v13 = vld [vmem:[%s5835_s1 + $0x6c4] ss:$20 sps:$4 sm:$0xff]  }
  0xe5   :  { %3811 = vmatpush3.bf16.msra.mxu0 %v4297_v10  ;;  %2599 = vmatprep.mubr.bf16.mxu0 %v4765_v23  ;;  %v4215_v23 = vld [vmem:[%s5835_s1 + $0x6c0] ss:$20 sps:$4 sm:$0xff]  }
  0xe6   :  { %3812 = vmatprep.subr.bf16.mxu0 %v4300_v12 }
  0xe7   :  { %2424 = vmatpush1.bf16.msra.mxu1 %v4209_v11 }
  0xe8   :  { %2425 = vmatprep.subr.bf16.mxu1 %v4214_v14 }
  0xe9   :  { %3813 = vmatpush3.bf16.msra.mxu0 %v4301_v15 }
  0xea   :  { %3814 = vmatprep.subr.bf16.mxu0 %v4304_v16 }
  0xeb   :  { %2426 = vmatpush1.bf16.msra.mxu1 %v4212_v17 }
  0xec   :  { %2427 = vmatprep.subr.bf16.mxu1 %v4217_v13 }
  0xed   :  { %3815 = vmatpush3.bf16.msra.mxu0 %v4305_v18 }
  0xee   :  { %3816 = vmatprep.subr.bf16.mxu0 %v4308_v20 }
  0xef   :  { %2428 = vmatpush1.bf16.msra.mxu1 %v4215_v23 }
  0xf0   :  { %2429 = vmatprep.subr.bf16.mxu1 %v4220_v21 }
  0xf1   :  { %3817 = vmatpush3.bf16.msra.mxu0 %v4309_v22 }
  0xf2   :  { %3818 = vmatprep.subr.bf16.mxu0 %v4312_v24 }
  0xf3   :  { %2430 = vmatpush1.bf16.msra.mxu1 %v4218_v25 }
  0xf4   :  { %2431 = vmatprep.subr.bf16.mxu1 %v4223_v26 }
  0xf5   :  { %3819 = vmatpush3.bf16.msra.mxu0 %v4313_v27 }
  0xf6   :  { %3820 = vmatprep.subr.bf16.mxu0 %v4316_v28 }
  0xf7   :  { %2432 = vmatpush1.bf16.msra.mxu1 %v4221_v29 }
  0xf8   :  { %2433 = vmatprep.subr.bf16.mxu1 %v4226_v30 }
  0xf9   :  { %3821 = vmatpush3.bf16.msra.mxu0 %v4317_v32 }
  0xfa   :  { %3822 = vmatprep.subr.bf16.mxu0 %v4320_v33 }
  0xfb   :  { %2434 = vmatpush1.bf16.msra.mxu1 %v4224_v34 }
  0xfc   :  { %2435 = vmatprep.subr.bf16.mxu1 %v4229_v35 }
  0xfd   :  { %3823 = vmatpush3.bf16.msra.mxu0 %v4321_v37 }
  0xfe   :  { %3824 = vmatprep.subr.bf16.mxu0 %v4324_v38 }
  0xff   :  { %2436 = vmatpush1.bf16.msra.mxu1 %v4227_v39 }
 0x100   :  { %2446 = vmatprep.subr.bf16.mxu1 %v4232_v40 }
 0x101   :  { %3825 = vmatpush3.bf16.msra.mxu0 %v4325_v41 }
 0x102   :  { %3095 = vmatprep.subr.bf16.mxu0 %v4335_v43  ;;  %2438 = vmatmul.mubr.bf16.vlgmr.msra.gmra.mrb[4].mxu1 %v4692_v63 }
 0x103   :  { %2447 = vmatpush1.bf16.msra.mxu1 %v4230_v44  ;;  %2478 = vmatprep.mubr.bf16.mxu1 %v4965_v31 }
 0x104   :  { %2448 = vmatprep.subr.bf16.mxu1 %v4235_v45  ;;  %2600 = vmatmul.mubr.bf16.vlgmr.msra.gmra.mrb[8].mxu0 %v4692_v63  ;;  %v4343_v63 = vld [vmem:[%s5837_s3 + $0x20] ss:$8 sps:$4 sm:$0xff]  }
 0x105   :  { %3096 = vmatpush1.bf16.msra.mxu0 %v4333_v46 }
 0x106   :  { %3097 = vmatprep.subr.bf16.mxu0 %v4340_v47 }
 0x107   :  { %2449 = vmatpush1.bf16.msra.mxu1 %v4233_v48 }
 0x108   :  { %2450 = vmatprep.subr.bf16.mxu1 %v4238_v49 }
 0x109   :  { %3098 = vmatpush1.bf16.msra.mxu0 %v4338_v62 }
 0x10a   :  { %3099 = vmatprep.subr.bf16.mxu0 %v4345_v50 }
 0x10b   :  { %2451 = vmatpush1.bf16.msra.mxu1 %v4236_v51 }
 0x10c   :  { %2452 = vmatprep.subr.bf16.mxu1 %v4241_v52 }
 0x10d   :  { %11 = vsyncpa [#allocation3], 0  ;;  %3100 = vmatpush1.bf16.msra.mxu0 %v4343_v63  ;;  %v4348_v56 = vld [vmem:[%s5837_s3 + $0x30] ss:$8 sps:$4 sm:$0xff]   ;;  %v4355_v57 = vld [vmem:[%s5837_s3 + $0x44] ss:$8 sps:$4 sm:$0xff]  }
 0x10e   :  { %3101 = vmatprep.subr.bf16.mxu0 %v4350_v53  ;;  %v4242_v58 = vld [vmem:[%s5835_s1 + $0x828] ss:$20 sps:$4 sm:$0xff]   ;;  %v4245_v0 = vld [vmem:[%s5835_s1 + $0x850] ss:$20 sps:$4 sm:$0xff]   ;;  %v4248_v8 = vld [vmem:[%s5835_s1 + $0x878] ss:$20 sps:$4 sm:$0xff]  }
 0x10f   :  { %2453 = vmatpush1.bf16.msra.mxu1 %v4239_v54  ;;  %v4247_v59 = vld [vmem:[%s5835_s1 + $0x854] ss:$20 sps:$4 sm:$0xff]   ;;  %v4250_v1 = vld [vmem:[%s5835_s1 + $0x87c] ss:$20 sps:$4 sm:$0xff]   ;;  %v4362_v6 = vld [vmem:[%s5837_s3 + $0x64] ss:$8 sps:$4 sm:$0xff]  }
 0x110   :  { %2454 = vmatprep.subr.bf16.mxu1 %v4244_v55  ;;  %v4353_v60 = vld [vmem:[%s5837_s3 + $0x40] ss:$8 sps:$4 sm:$0xff]   ;;  %v4359_v61 = vld [vmem:[%s5837_s3 + $0x54] ss:$8 sps:$4 sm:$0xff]   ;;  %v4357_v4 = vld [vmem:[%s5837_s3 + $0x50] ss:$8 sps:$4 sm:$0xff]  }
 0x111   :  { %3102 = vmatpush1.bf16.msra.mxu0 %v4348_v56  ;;  %v4253_v10 = vld [vmem:[%s5835_s1 + $0x8a4] ss:$20 sps:$4 sm:$0xff]   ;;  %v4360_v11 = vld [vmem:[%s5837_s3 + $0x60] ss:$8 sps:$4 sm:$0xff]   ;;  %v4365_v12 = vld [vmem:[%s5837_s3 + $0x74] ss:$8 sps:$4 sm:$0xff]  }
 0x112   :  { %3103 = vmatprep.subr.bf16.mxu0 %v4355_v57  ;;  %v4251_v14 = vld [vmem:[%s5835_s1 + $0x8a0] ss:$20 sps:$4 sm:$0xff]   ;;  %v4363_v16 = vld [vmem:[%s5837_s3 + $0x70] ss:$8 sps:$4 sm:$0xff]   ;;  %v4368_v17 = vld [vmem:[%s5837_s3 + $0x84] ss:$8 sps:$4 sm:$0xff]  }
 0x113   :  { %2455 = vmatpush1.bf16.msra.mxu1 %v4242_v58  ;;  %v4256_v15 = vld [vmem:[%s5835_s1 + $0x8cc] ss:$20 sps:$4 sm:$0xff]   ;;  %v4254_v13 = vld [vmem:[%s5835_s1 + $0x8c8] ss:$20 sps:$4 sm:$0xff]   ;;  %v4259_v21 = vld [vmem:[%s5835_s1 + $0x8f0] ss:$20 sps:$4 sm:$0xff]  }
 0x114   :  { %2456 = vmatprep.subr.bf16.mxu1 %v4247_v59  ;;  %v4261_v18 = vld [vmem:[%s5835_s1 + $0x8f4] ss:$20 sps:$4 sm:$0xff]   ;;  %v4266_v22 = vld [vmem:[%s5835_s1 + $0x91c] ss:$20 sps:$4 sm:$0xff]   ;;  %v4374_v25 = vld [vmem:[%s5837_s3 + $0xa4] ss:$8 sps:$4 sm:$0xff]  }
 0x115   :  { %v5422_v2 = vpop.f32.mrb[0].mxu1  ;;  %3104 = vmatpush1.bf16.msra.mxu0 %v4353_v60  ;;  %v4366_v20 = vld [vmem:[%s5837_s3 + $0x80] ss:$8 sps:$4 sm:$0xff]   ;;  %v4371_v23 = vld [vmem:[%s5837_s3 + $0x94] ss:$8 sps:$4 sm:$0xff]   ;;  %vm3088_vm2 = vcmask 1043456  }
 0x116   :  { %v5427_v5 = vpop.f32.mrb[1].mxu1  ;;  %3105 = vmatprep.subr.bf16.mxu0 %v4359_v61  ;;  %v4369_v24 = vld [vmem:[%s5837_s3 + $0x90] ss:$8 sps:$4 sm:$0xff]   ;;  %v4372_v28 = vld [vmem:[%s5837_s3 + $0xa0] ss:$8 sps:$4 sm:$0xff]   ;;  %vm3084_vm6 = vcmask 64512  }
 0x117   :  { %v2197_v7 = vpop.f32.mrb[2].mxu1  ;;  %2457 = vmatpush1.bf16.msra.mxu1 %v4245_v0  ;;  %v4264_v26 = vld [vmem:[%s5835_s1 + $0x918] ss:$20 sps:$4 sm:$0xff]   ;;  %v4377_v29 = vld [vmem:[%s5837_s3 + $0xb4] ss:$8 sps:$4 sm:$0xff]  }
 0x118   :  { %v2198_v9 = vpop.f32.mrb[3].mxu1  ;;  %2458 = vmatprep.subr.bf16.mxu1 %v4250_v1  ;;  %v4271_v27 = vld [vmem:[%s5835_s1 + $0x944] ss:$20 sps:$4 sm:$0xff]   ;;  %v4269_v30 = vld [vmem:[%s5835_s1 + $0x940] ss:$20 sps:$4 sm:$0xff]  }
 0x119   :  { %3106 = vmatpush1.bf16.msra.mxu0 %v4357_v4  ;;  %v4276_v32 = vld [vmem:[%s5835_s1 + $0x96c] ss:$20 sps:$4 sm:$0xff]   ;;  %v4375_v33 = vld [vmem:[%s5837_s3 + $0xb0] ss:$8 sps:$4 sm:$0xff]   ;;  %v4274_v35 = vld [vmem:[%s5835_s1 + $0x968] ss:$20 sps:$4 sm:$0xff]  }
 0x11a   :  { %3107 = vmatprep.subr.bf16.mxu0 %v4362_v6  ;;  %v4380_v34 = vld [vmem:[%s5837_s3 + $0xc4] ss:$8 sps:$4 sm:$0xff]   ;;  %v4281_v37 = vld [vmem:[%s5835_s1 + $0x994] ss:$20 sps:$4 sm:$0xff]   ;;  %v4286_v41 = vld [vmem:[%s5835_s1 + $0x9bc] ss:$20 sps:$4 sm:$0xff]  }
 0x11b   :  { %2459 = vmatpush1.bf16.msra.mxu1 %v4248_v8  ;;  %v4378_v38 = vld [vmem:[%s5837_s3 + $0xc0] ss:$8 sps:$4 sm:$0xff]   ;;  %v4383_v39 = vld [vmem:[%s5837_s3 + $0xd4] ss:$8 sps:$4 sm:$0xff]   ;;  %v4279_v40 = vld [vmem:[%s5835_s1 + $0x990] ss:$20 sps:$4 sm:$0xff]  }
 0x11c   :  { %2460 = vmatprep.subr.bf16.mxu1 %v4253_v10  ;;  %v4381_v43 = vld [vmem:[%s5837_s3 + $0xd0] ss:$8 sps:$4 sm:$0xff]   ;;  %v4386_v44 = vld [vmem:[%s5837_s3 + $0xe4] ss:$8 sps:$4 sm:$0xff]   ;;  %v4384_v47 = vld [vmem:[%s5837_s3 + $0xe0] ss:$8 sps:$4 sm:$0xff]  }
 0x11d   :  { %3108 = vmatpush1.bf16.msra.mxu0 %v4360_v11  ;;  %v4284_v45 = vld [vmem:[%s5835_s1 + $0x9b8] ss:$20 sps:$4 sm:$0xff]   ;;  %v4389_v48 = vld [vmem:[%s5837_s3 + $0xf4] ss:$8 sps:$4 sm:$0xff]   ;;  %v4294_v62 = vld [vmem:[%s5835_s1 + $0x3d0] ss:$20 sps:$4 sm:$0xff]  }
 0x11e   :  { %3109 = vmatprep.subr.bf16.mxu0 %v4365_v12  ;;  %v4291_v46 = vld [vmem:[%s5835_s1 + $0x9e4] ss:$20 sps:$4 sm:$0xff]   ;;  %v4289_v49 = vld [vmem:[%s5835_s1 + $0x9e0] ss:$20 sps:$4 sm:$0xff]   ;;  %v4306_v56 = vld [vmem:[%s5835_s1 + $0x448] ss:$20 sps:$4 sm:$0xff]  }
 0x11f   :  { %2461 = vmatpush1.bf16.msra.mxu1 %v4251_v14  ;;  %v4387_v50 = vld [vmem:[%s5837_s3 + $0xf0] ss:$8 sps:$4 sm:$0xff]   ;;  %v4392_v51 = vld [vmem:[%s5837_s3 + $0x104] ss:$8 sps:$4 sm:$0xff]   ;;  %v4302_v54 = vld [vmem:[%s5835_s1 + $0x420] ss:$20 sps:$4 sm:$0xff]  }
 0x120   :  { %2462 = vmatprep.subr.bf16.mxu1 %v4256_v15  ;;  %v4295_v52 = vld [vmem:[%s5835_s1 + $0x290] ss:$20 sps:$4 sm:$0xff]   ;;  %v4298_v63 = vld [vmem:[%s5835_s1 + $0x3f8] ss:$20 sps:$4 sm:$0xff]   ;;  %v4303_v55 = vld [vmem:[%s5835_s1 + $0x2e0] ss:$20 sps:$4 sm:$0xff]  }
 0x121   :  { %3110 = vmatpush1.bf16.msra.mxu0 %v4363_v16  ;;  %v4299_v53 = vld [vmem:[%s5835_s1 + $0x2b8] ss:$20 sps:$4 sm:$0xff]   ;;  %v4310_v57 = vld [vmem:[%s5835_s1 + $0x470] ss:$20 sps:$4 sm:$0xff]   ;;  %v4318_v61 = vld [vmem:[%s5835_s1 + $0x4c0] ss:$20 sps:$4 sm:$0xff]  }
 0x122   :  { %3111 = vmatprep.subr.bf16.mxu0 %v4368_v17  ;;  %v4311_v58 = vld [vmem:[%s5835_s1 + $0x330] ss:$20 sps:$4 sm:$0xff]   ;;  %v4314_v59 = vld [vmem:[%s5835_s1 + $0x498] ss:$20 sps:$4 sm:$0xff]   ;;  %v4319_v0 = vld [vmem:[%s5835_s1 + $0x380] ss:$20 sps:$4 sm:$0xff]  }
 0x123   :  { %2463 = vmatpush1.bf16.msra.mxu1 %v4254_v13  ;;  %v4315_v60 = vld [vmem:[%s5835_s1 + $0x358] ss:$20 sps:$4 sm:$0xff]   ;;  %v4322_v1 = vld [vmem:[%s5835_s1 + $0x4e8] ss:$20 sps:$4 sm:$0xff]   ;;  %v4326_v6 = vld [vmem:[%s5835_s1 + $0x8d0] ss:$20 sps:$4 sm:$0xff]  }
 0x124   :  { %2464 = vmatprep.subr.bf16.mxu1 %v4261_v18  ;;  %v4323_v4 = vld [vmem:[%s5835_s1 + $0x3a8] ss:$20 sps:$4 sm:$0xff]   ;;  %v4327_v7 = vld [vmem:[%s5835_s1 + $0x790] ss:$20 sps:$4 sm:$0xff]   ;;  %v4328_v8 = vld [vmem:[%s5835_s1 + $0x8f8] ss:$20 sps:$4 sm:$0xff]  }
 0x125   :  { %3112 = vmatpush1.bf16.msra.mxu0 %v4366_v20  ;;  %v4329_v9 = vld [vmem:[%s5835_s1 + $0x7b8] ss:$20 sps:$4 sm:$0xff]   ;;  %v4330_v10 = vld [vmem:[%s5835_s1 + $0x920] ss:$20 sps:$4 sm:$0xff]   ;;  %v4337_v12 = vld [vmem:[%s5835_s1 + $0x970] ss:$20 sps:$4 sm:$0xff]  }
 0x126   :  { %3113 = vmatprep.subr.bf16.mxu0 %v4371_v23  ;;  %v4331_v11 = vld [vmem:[%s5835_s1 + $0x7e0] ss:$20 sps:$4 sm:$0xff]   ;;  %v4341_v14 = vld [vmem:[%s5835_s1 + $0x830] ss:$20 sps:$4 sm:$0xff]   ;;  %v4342_v15 = vld [vmem:[%s5835_s1 + $0x998] ss:$20 sps:$4 sm:$0xff]  }
 0x127   :  { %2465 = vmatpush1.bf16.msra.mxu1 %v4259_v21  ;;  %v4346_v16 = vld [vmem:[%s5835_s1 + $0x858] ss:$20 sps:$4 sm:$0xff]   ;;  %v4347_v17 = vld [vmem:[%s5835_s1 + $0x9c0] ss:$20 sps:$4 sm:$0xff]   ;;  %v4352_v18 = vld [vmem:[%s5835_s1 + $0x9e8] ss:$20 sps:$4 sm:$0xff]  }
 0x128   :  { %2466 = vmatprep.subr.bf16.mxu1 %v4266_v22  ;;  %v4351_v13 = vld [vmem:[%s5835_s1 + $0x880] ss:$20 sps:$4 sm:$0xff]   ;;  %v4356_v20 = vld [vmem:[%s5835_s1 + $0x8a8] ss:$20 sps:$4 sm:$0xff]   ;;  %v414_v23 = vsub.s32 0, %v4642_v42  ;;  %v418_v22 = vsub.s32 1, %v4642_v42 }
 0x129   :  { %3114 = vmatpush1.bf16.msra.mxu0 %v4369_v24  ;;  %v5654_v21 = vld [vmem:[%s5836_s2] sm:$0x1f] }
 0x12a   :  { %3115 = vmatprep.subr.bf16.mxu0 %v4374_v25  ;;  %v415_v24 = vrot.slane %v5654_v21, %v414_v23  ;;  %v419_v25 = vrot.slane %v5654_v21, %v418_v22 }
 0x12b   :  { %2467 = vmatpush1.bf16.msra.mxu1 %v4264_v26 }
 0x12c   :  { %2468 = vmatprep.subr.bf16.mxu1 %v4271_v27  ;;  %v2194_v26 = vadd.f32 %v5422_v2, %v415_v24  ;;  %v4432_v24 = vld [vmem:[%s5837_s3 + $0x1e0] ss:$8 sps:$4 sm:$0xff]  }
 0x12d   :  { %3116 = vmatpush1.bf16.msra.mxu0 %v4372_v28 }
 0x12e   :  { %3117 = vmatprep.subr.bf16.mxu0 %v4377_v29 }
 0x12f   :  { %2469 = vmatpush1.bf16.msra.mxu1 %v4269_v30 }
 0x130   :  { %2470 = vmatprep.subr.bf16.mxu1 %v4276_v32 }
 0x131   :  { %3118 = vmatpush1.bf16.msra.mxu0 %v4375_v33 }
 0x132   :  { %3119 = vmatprep.subr.bf16.mxu0 %v4380_v34 }
 0x133   :  { %2471 = vmatpush1.bf16.msra.mxu1 %v4274_v35 }
 0x134   :  { %2472 = vmatprep.subr.bf16.mxu1 %v4281_v37 }
 0x135   :  { %3120 = vmatpush1.bf16.msra.mxu0 %v4378_v38 }
 0x136   :  { %3121 = vmatprep.subr.bf16.mxu0 %v4383_v39 }
 0x137   :  { %2473 = vmatpush1.bf16.msra.mxu1 %v4279_v40 }
 0x138   :  { %2474 = vmatprep.subr.bf16.mxu1 %v4286_v41 }
 0x139   :  { %3122 = vmatpush1.bf16.msra.mxu0 %v4381_v43 }
 0x13a   :  { %3123 = vmatprep.subr.bf16.mxu0 %v4386_v44 }
 0x13b   :  { %2475 = vmatpush1.bf16.msra.mxu1 %v4284_v45  ;;  %v4390_v45 = vld [vmem:[%s5837_s3 + $0x100] ss:$8 sps:$4 sm:$0xff]  }
 0x13c   :  { %2476 = vmatprep.subr.bf16.mxu1 %v4291_v46 }
 0x13d   :  { %3124 = vmatpush1.bf16.msra.mxu0 %v4384_v47  ;;  %v4395_v47 = vld [vmem:[%s5837_s3 + $0x114] ss:$8 sps:$4 sm:$0xff]  }
 0x13e   :  { %3125 = vmatprep.subr.bf16.mxu0 %v4389_v48  ;;  %v4393_v48 = vld [vmem:[%s5837_s3 + $0x110] ss:$8 sps:$4 sm:$0xff]  }
 0x13f   :  { %2477 = vmatpush1.bf16.msra.mxu1 %v4289_v49  ;;  %v4398_v49 = vld [vmem:[%s5837_s3 + $0x124] ss:$8 sps:$4 sm:$0xff]  }
 0x140   :  { %3788 = vmatprep.subr.bf16.mxu1 %v4294_v62  ;;  %v4396_v62 = vld [vmem:[%s5837_s3 + $0x120] ss:$8 sps:$4 sm:$0xff]  }
 0x141   :  { %3126 = vmatpush1.bf16.msra.mxu0 %v4387_v50  ;;  %v4401_v50 = vld [vmem:[%s5837_s3 + $0x134] ss:$8 sps:$4 sm:$0xff]  }
 0x142   :  { %2479 = vmatmul.mubr.bf16.vlgmr.msra.gmra.mrb[4].mxu1 %v5153_v36  ;;  %3136 = vmatprep.subr.bf16.mxu0 %v4392_v51 }
 0x143   :  { %3789 = vmatpush3.bf16.msra.mxu1 %v4295_v52  ;;  %2559 = vmatprep.mubr.bf16.mxu1 %v4705_v3  ;;  %v4307_v3 = vld [vmem:[%s5835_s1 + $0x308] ss:$20 sps:$4 sm:$0xff]   ;;  %v4399_v52 = vld [vmem:[%s5837_s3 + $0x130] ss:$8 sps:$4 sm:$0xff]  }
 0x144   :  { %3790 = vmatprep.subr.bf16.mxu1 %v4298_v63 }
 0x147   :  { %3791 = vmatpush3.bf16.msra.mxu1 %v4299_v53  ;;  %v4404_v53 = vld [vmem:[%s5837_s3 + $0x144] ss:$8 sps:$4 sm:$0xff]  }
 0x148   :  { %3792 = vmatprep.subr.bf16.mxu1 %v4302_v54 }
 0x14b   :  { %3793 = vmatpush3.bf16.msra.mxu1 %v4303_v55 }
 0x14c   :  { %3794 = vmatprep.subr.bf16.mxu1 %v4306_v56 }
 0x14f   :  { %3795 = vmatpush3.bf16.msra.mxu1 %v4307_v3  ;;  %v4402_v3 = vld [vmem:[%s5837_s3 + $0x140] ss:$8 sps:$4 sm:$0xff]  }
 0x150   :  { %3796 = vmatprep.subr.bf16.mxu1 %v4310_v57  ;;  %v4407_v57 = vld [vmem:[%s5837_s3 + $0x154] ss:$8 sps:$4 sm:$0xff]  }
 0x153   :  { %3797 = vmatpush3.bf16.msra.mxu1 %v4311_v58  ;;  %v4405_v58 = vld [vmem:[%s5837_s3 + $0x150] ss:$8 sps:$4 sm:$0xff]  }
 0x154   :  { %3798 = vmatprep.subr.bf16.mxu1 %v4314_v59  ;;  %v4410_v59 = vld [vmem:[%s5837_s3 + $0x164] ss:$8 sps:$4 sm:$0xff]  }
 0x157   :  { %3799 = vmatpush3.bf16.msra.mxu1 %v4315_v60  ;;  %v4408_v60 = vld [vmem:[%s5837_s3 + $0x160] ss:$8 sps:$4 sm:$0xff]  }
 0x158   :  { %3800 = vmatprep.subr.bf16.mxu1 %v4318_v61  ;;  %v4413_v61 = vld [vmem:[%s5837_s3 + $0x174] ss:$8 sps:$4 sm:$0xff]  }
 0x15b   :  { %3801 = vmatpush3.bf16.msra.mxu1 %v4319_v0  ;;  %v4411_v0 = vld [vmem:[%s5837_s3 + $0x170] ss:$8 sps:$4 sm:$0xff]  }
 0x15c   :  { %3802 = vmatprep.subr.bf16.mxu1 %v4322_v1  ;;  %v4416_v1 = vld [vmem:[%s5837_s3 + $0x184] ss:$8 sps:$4 sm:$0xff]  }
 0x15f   :  { %3803 = vmatpush3.bf16.msra.mxu1 %v4323_v4  ;;  %v4414_v4 = vld [vmem:[%s5837_s3 + $0x180] ss:$8 sps:$4 sm:$0xff]  }
 0x160   :  { %3832 = vmatprep.subr.bf16.mxu1 %v4326_v6  ;;  %v4419_v6 = vld [vmem:[%s5837_s3 + $0x194] ss:$8 sps:$4 sm:$0xff]  }
 0x162   :  { %2560 = vmatmul.mubr.bf16.vlgmr.msra.gmra.mrb[8].mxu1 %v4753_v19  ;;  %v4332_v19 = vld [vmem:[%s5835_s1 + $0x948] ss:$20 sps:$4 sm:$0xff]  }
 0x163   :  { %3833 = vmatpush3.bf16.msra.mxu1 %v4327_v7  ;;  %2639 = vmatprep.mubr.bf16.mxu1 %v4965_v31  ;;  %v4336_v31 = vld [vmem:[%s5835_s1 + $0x808] ss:$20 sps:$4 sm:$0xff]   ;;  %v4417_v7 = vld [vmem:[%s5837_s3 + $0x190] ss:$8 sps:$4 sm:$0xff]  }
 0x164   :  { %3834 = vmatprep.subr.bf16.mxu1 %v4328_v8  ;;  %v4422_v8 = vld [vmem:[%s5837_s3 + $0x1a4] ss:$8 sps:$4 sm:$0xff]  }
 0x167   :  { %3835 = vmatpush3.bf16.msra.mxu1 %v4329_v9  ;;  %v4420_v9 = vld [vmem:[%s5837_s3 + $0x1a0] ss:$8 sps:$4 sm:$0xff]  }
 0x168   :  { %3836 = vmatprep.subr.bf16.mxu1 %v4330_v10  ;;  %v4425_v10 = vld [vmem:[%s5837_s3 + $0x1b4] ss:$8 sps:$4 sm:$0xff]  }
 0x16b   :  { %3837 = vmatpush3.bf16.msra.mxu1 %v4331_v11  ;;  %v4423_v11 = vld [vmem:[%s5837_s3 + $0x1b0] ss:$8 sps:$4 sm:$0xff]  }
 0x16c   :  { %3838 = vmatprep.subr.bf16.mxu1 %v4332_v19 }
 0x16f   :  { %3839 = vmatpush3.bf16.msra.mxu1 %v4336_v31  ;;  %v4428_v31 = vld [vmem:[%s5837_s3 + $0x1c4] ss:$8 sps:$4 sm:$0xff]  }
 0x170   :  { %3840 = vmatprep.subr.bf16.mxu1 %v4337_v12 }
 0x173   :  { %3841 = vmatpush3.bf16.msra.mxu1 %v4341_v14 }
 0x174   :  { %3842 = vmatprep.subr.bf16.mxu1 %v4342_v15 }
 0x177   :  { %3843 = vmatpush3.bf16.msra.mxu1 %v4346_v16 }
 0x178   :  { %3844 = vmatprep.subr.bf16.mxu1 %v4347_v17  ;;  %v4426_v17 = vld [vmem:[%s5837_s3 + $0x1c0] ss:$8 sps:$4 sm:$0xff]  }
 0x17b   :  { %3845 = vmatpush3.bf16.msra.mxu1 %v4351_v13  ;;  %v4431_v13 = vld [vmem:[%s5837_s3 + $0x1d4] ss:$8 sps:$4 sm:$0xff]  }
 0x17c   :  { %3846 = vmatprep.subr.bf16.mxu1 %v4352_v18  ;;  %v4429_v18 = vld [vmem:[%s5837_s3 + $0x1d0] ss:$8 sps:$4 sm:$0xff]  }
 0x17f   :  { %3847 = vmatpush3.bf16.msra.mxu1 %v4356_v20  ;;  %v4434_v20 = vld [vmem:[%s5837_s3 + $0x1e4] ss:$8 sps:$4 sm:$0xff]  }
 0x182   :  { %2640 = vmatmul.mubr.bf16.vlgmr.msra.gmra.mrb[12].mxu1 %v5153_v36  ;;  %v2196_v36 = vadd.f32 %v5427_v5, %v419_v25  ;;  %v4437_v25 = vld [vmem:[%s5837_s3 + $0x1f4] ss:$8 sps:$4 sm:$0xff]  }
 0x196   :  { %v2316_v27 = vpop.f32.mrb[0].mxu0 }
 0x197   :  { %v3855_v28 = vadd.f32 %v2316_v27, %v2194_v26  ;;  %v2318_v29 = vpop.f32.mrb[1].mxu0  ;;  %v4435_v26 = vld [vmem:[%s5837_s3 + $0x1f0] ss:$8 sps:$4 sm:$0xff]  }
 0x198   :  { %v3857_v30 = vadd.f32 %v2318_v29, %v2196_v36  ;;  %v2320_v32 = vpop.f32.mrb[2].mxu0  ;;  %v2746_v36 = vld [vmem:[%s5837_s3 + $0x200] sm:$0xff] }
 0x199   :  { %v2652_v33 = vmin.f32 %v3855_v28, 0.0  ;;  %v2321_v34 = vpop.f32.mrb[3].mxu0  ;;  %vm2647_vm0 = vcmp.gt.f32.partialorder %v3855_v28, 0.0  ;;  %v3751_v27 = vcombine.high %v2746_v36, %v2746_v36  ;;  %v4440_v29 = vld [vmem:[%s5839_s5] sm:$0xff]   ;;  %v4442_v32 = vld [vmem:[%s5839_s5 + $0x10] sm:$0xff]  }
 0x19a   :  { %v2653_v35 = vmin.f32 %v3857_v30, 0.0  ;;  %vm2648_vm1 = vcmp.gt.f32.partialorder %v3857_v30, 0.0  ;;  %v426_v34 = vsub.s32 3, %v4642_v42 }
 0x19b   :  { %v2657_v37 = vmul.f32 1.442695, %v2652_v33  ;;  %v422_v33 = vsub.s32 2, %v4642_v42 }
 0x19c   :  { %v2659_v38 = vmul.f32 1.442695, %v2653_v35 }
 0x19d   :  { %4449 = vpow2.f32 %v2657_v37  ;;  %v423_v35 = vrot.slane %v5654_v21, %v422_v33  ;;  %v427_v37 = vrot.slane %v5654_v21, %v426_v34 }
 0x19e   :  { %4451 = vpow2.f32 %v2659_v38 }
 0x1a7   :  { %v4450_v39 = vpop.eup %4449 }
 0x1a8   :  { %v4452_v40 = vpop.eup %4451  ;;  %v3681_v41 = vadd.f32 -1.0, %v4450_v39 }
 0x1a9   :  { %v3682_v43 = vadd.f32 -1.0, %v4452_v40 }
 0x1aa   :  { %v2672_v2 = vsel %vm2647_vm0, %v3855_v28, %v3681_v41  ;;  %v4488_v28 = vmov 0  }
 0x1ab   :  { %v2673_v5 = vsel %vm2648_vm1, %v3857_v30, %v3682_v43  ;;  %v2677_v46 = vpack.c.bf16 %v2672_v2, %v2672_v2  ;;  %3306 = vmatprep.subr.bf16.mxu1 %v4488_v28  ;;  %v4441_v30 = vld [vmem:[%s5839_s5 + $0x8] sm:$0xff]  }
 0x1ac   :  { %v2678_v44 = vpack.c.bf16 %v2673_v5, %v2673_v5  ;;  %3307 = vmatpush1.bf16.msra.mxu1 %v4440_v29 }
 0x1ad   :  { %3308 = vmatprep.subr.bf16.mxu1 %v4488_v28 }
 0x1ae   :  { %3127 = vmatprep.mubr.bf16.mxu0 %v2678_v44 }
 0x1af   :  { %3128 = vmatmul.mubr.bf16.vlgmr.msra.gmra.mrb[12].mxu0 %v2677_v46 }
 0x1b0   :  { %3137 = vmatpush1.bf16.msra.mxu0 %v4390_v45  ;;  %3309 = vmatpush1.bf16.msra.mxu1 %v4441_v30 }
 0x1b1   :  { %3138 = vmatprep.subr.bf16.mxu0 %v4395_v47  ;;  %3310 = vmatprep.subr.bf16.mxu1 %v4488_v28 }
 0x1b4   :  { %3139 = vmatpush1.bf16.msra.mxu0 %v4393_v48  ;;  %3311 = vmatpush1.bf16.msra.mxu1 %v4442_v32 }
 0x1b5   :  { %3140 = vmatprep.subr.bf16.mxu0 %v4398_v49  ;;  %3312 = vmatprep.subr.bf16.mxu1 %v4488_v28 }
 0x1b7   :  { %v3782_v51 = vpop.f32.mrb[4].mxu0 }
 0x1b8   :  { %3141 = vmatpush1.bf16.msra.mxu0 %v4396_v62  ;;  %v3783_v63 = vpop.f32.mrb[5].mxu0 }
 0x1b9   :  { %3142 = vmatprep.subr.bf16.mxu0 %v4401_v50  ;;  %v5689_v54 = vadd.f32 %v3783_v63, %v3782_v51  ;;  %v3785_v55 = vpop.f32.mrb[6].mxu0  ;;  %v3750_v50 = vcombine.low %v2746_v36, %v2746_v36 }
 0x1ba   :  { %v3786_v56 = vpop.f32.mrb[7].mxu0 }
 0x1bb   :  { %v3090_v55 = vsel %vm3088_vm2, %v3750_v50, 0  ;;  %v430_v56 = vsub.s32 4, %v4642_v42 }
 0x1bc   :  { %3143 = vmatpush1.bf16.msra.mxu0 %v4399_v52 }
 0x1bd   :  { %3144 = vmatprep.subr.bf16.mxu0 %v4404_v53 }
 0x1c0   :  { %3145 = vmatpush1.bf16.msra.mxu0 %v4402_v3  ;;  %v431_v3 = vrot.slane %v5654_v21, %v430_v56 }
 0x1c1   :  { %3146 = vmatprep.subr.bf16.mxu0 %v4407_v57 }
 0x1c2   :  { %v2522_v57 = vadd.f32 %v5689_v54, %v431_v3 }
 0x1c4   :  { %3147 = vmatpush1.bf16.msra.mxu0 %v4405_v58 }
 0x1c5   :  { %3148 = vmatprep.subr.bf16.mxu0 %v4410_v59 }
 0x1c8   :  { %3149 = vmatpush1.bf16.msra.mxu0 %v4408_v60 }
 0x1c9   :  { %3150 = vmatprep.subr.bf16.mxu0 %v4413_v61 }
 0x1cc   :  { %3151 = vmatpush1.bf16.msra.mxu0 %v4411_v0 }
 0x1cd   :  { %3152 = vmatprep.subr.bf16.mxu0 %v4416_v1 }
 0x1d0   :  { %3153 = vmatpush1.bf16.msra.mxu0 %v4414_v4 }
 0x1d1   :  { %3154 = vmatprep.subr.bf16.mxu0 %v4419_v6 }
 0x1d4   :  { %3155 = vmatpush1.bf16.msra.mxu0 %v4417_v7 }
 0x1d5   :  { %3156 = vmatprep.subr.bf16.mxu0 %v4422_v8 }
 0x1d7   :  { %v3826_v19 = vpop.f32.mrb[8].mxu0 }
 0x1d8   :  { %3157 = vmatpush1.bf16.msra.mxu0 %v4420_v9  ;;  %v3827_v12 = vpop.f32.mrb[9].mxu0 }
 0x1d9   :  { %3158 = vmatprep.subr.bf16.mxu0 %v4425_v10  ;;  %v5739_v14 = vadd.f32 %v3827_v12, %v3826_v19  ;;  %v3829_v15 = vpop.f32.mrb[10].mxu0 }
 0x1da   :  { %v3830_v16 = vpop.f32.mrb[11].mxu0 }
 0x1db   :  { %v4444_v16 = vld [vmem:[%s5839_s5 + $0x20] sm:$0xff]  }
 0x1dc   :  { %3159 = vmatpush1.bf16.msra.mxu0 %v4423_v11 }
 0x1dd   :  { %3160 = vmatprep.subr.bf16.mxu0 %v4428_v31 }
 0x1e0   :  { %3161 = vmatpush1.bf16.msra.mxu0 %v4426_v17  ;;  %v4445_v17 = vld [vmem:[%s5839_s5 + $0x28] sm:$0xff]  }
 0x1e1   :  { %3162 = vmatprep.subr.bf16.mxu0 %v4431_v13  ;;  %v4446_v13 = vld [vmem:[%s5839_s5 + $0x30] sm:$0xff]  }
 0x1e4   :  { %3163 = vmatpush1.bf16.msra.mxu0 %v4429_v18  ;;  %v4447_v18 = vld [vmem:[%s5839_s5 + $0x38] sm:$0xff]  }
 0x1e5   :  { %3164 = vmatprep.subr.bf16.mxu0 %v4434_v20  ;;  %v4448_v20 = vld [vmem:[%s5839_s5 + $0x40] ss:$0 sps:$4 sm:$0xff]  }
 0x1e8   :  { %3165 = vmatpush1.bf16.msra.mxu0 %v4432_v24  ;;  %v3304_v24 = vsel %vm3088_vm2, %v4448_v20, 0 }
 0x1e9   :  { %3166 = vmatprep.subr.bf16.mxu0 %v4437_v25  ;;  %v2747_v25 = vld [vmem:[%s5838_s4] sm:$0x3]  ;;  %s4489_s4 = smov [#allocation2]  }
 0x1ea   :  { %v2756_v36 = vrot.slane %v2747_v25, %v418_v22 }
 0x1ec   :  { %3167 = vmatpush1.bf16.msra.mxu0 %v4435_v26  ;;  %v2752_v26 = vrot.slane %v2747_v25, %v414_v23 }
 0x1ed   :  { %3752 = vmatprep.subr.msk.bf16.mxu0 %vm3088_vm2, %v3751_v27 }
 0x215   :  { %v2480_v38 = vpop.f32.mrb[4].mxu1 }
 0x216   :  { %v3858_v39 = vadd.f32 %v2480_v38, %v423_v35  ;;  %v2482_v40 = vpop.f32.mrb[5].mxu1 }
 0x217   :  { %v3859_v41 = vadd.f32 %v2482_v40, %v427_v37  ;;  %v2484_v43 = vpop.f32.mrb[6].mxu1 }
 0x218   :  { %v2654_v2 = vmin.f32 %v3858_v39, 0.0  ;;  %v2485_v5 = vpop.f32.mrb[7].mxu1  ;;  %vm2649_vm3 = vcmp.gt.f32.partialorder %v3858_v39, 0.0 }
 0x219   :  { %v2655_v44 = vmin.f32 %v3859_v41, 0.0  ;;  %vm2650_vm4 = vcmp.gt.f32.partialorder %v3859_v41, 0.0 }
 0x21a   :  { %v2661_v45 = vmul.f32 1.442695, %v2654_v2 }
 0x21b   :  { %v2663_v46 = vmul.f32 1.442695, %v2655_v44 }
 0x21c   :  { %4453 = vpow2.f32 %v2661_v45 }
 0x21d   :  { %4455 = vpow2.f32 %v2663_v46 }
 0x226   :  { %v4454_v47 = vpop.eup %4453 }
 0x227   :  { %v4456_v48 = vpop.eup %4455  ;;  %v3683_v49 = vadd.f32 -1.0, %v4454_v47 }
 0x228   :  { %v3684_v62 = vadd.f32 -1.0, %v4456_v48 }
 0x229   :  { %v2674_v51 = vsel %vm2649_vm3, %v3858_v39, %v3683_v49 }
 0x22a   :  { %v2675_v52 = vsel %vm2650_vm4, %v3859_v41, %v3684_v62  ;;  %v2679_v53 = vpack.c.bf16 %v2674_v51, %v2674_v51 }
 0x22b   :  { %v2680_v63 = vpack.c.bf16 %v2675_v52, %v2675_v52 }
 0x22d   :  { %3168 = vmatprep.mubr.bf16.mxu0 %v2680_v63 }
 0x22e   :  { %3169 = vmatmul.mubr.bf16.vlgmr.msra.gmra.mrb[12].mxu0 %v2679_v53 }
 0x22f   :  { %3178 = vmatpush1.bf16.msra.mxu0 %v3090_v55  ;;  %3209 = vmatprep.mubr.bf16.mxu0 %v4488_v28 }
 0x235   :  { %v3804_v58 = vpop.f32.mrb[8].mxu1 }
 0x236   :  { %v3805_v59 = vpop.f32.mrb[9].mxu1 }
 0x237   :  { %v3806_v60 = vadd.f32 %v3805_v59, %v3804_v58  ;;  %v3807_v61 = vpop.f32.mrb[10].mxu1 }
 0x238   :  { %v3808_v0 = vpop.f32.mrb[11].mxu1 }
 0x239   :  { %v2562_v1 = vadd.f32 %v3806_v60, %v2522_v57 }
 0x23b   :  { %v2602_v4 = vadd.f32 %v5739_v14, %v2562_v1  ;;  %v4443_v14 = vld [vmem:[%s5839_s5 + $0x18] sm:$0xff]   ;;  %s3353_s5 = sshll.u32 %s4489_s4, 4  ;;  %s3354_s5 = int_to_ptr.vmem [resolvable:$true] %s3353_s5 }
 0x23c   :  { %3313 = vmatpush1.bf16.msra.mxu1 %v4443_v14  ;;  %s4463_s10 = scalar_lea.vmem %s3354_s5, 32  ;;  %p4468_p1 = scmp.lt.s32.totalorder %s3354_s5, %s3354_s5 }
 0x23d   :  { %3314 = vmatprep.subr.bf16.mxu1 %v4488_v28  ;;  %p4464_p0 = scmp.ne.s32.totalorder %s3354_s5, %s4463_s10  ;;  %p4469_p2 = scmp.lt.s32.totalorder %s4463_s10, %s4463_s10 }
 0x23f   :  { %p4470_p3 = por %p4469_p2, %p4468_p1 }
 0x240   :  { %3315 = vmatpush1.bf16.msra.mxu1 %v4444_v16 }
 0x241   :  { %3316 = vmatprep.subr.bf16.mxu1 %v4488_v28  ;;  %p4471_p4 = pnand %p4470_p3, %p4464_p0 }
 0x244   :  { %3317 = vmatpush1.bf16.msra.mxu1 %v4445_v17 }
 0x245   :  { %3318 = vmatprep.subr.bf16.mxu1 %v4488_v28 }
 0x248   :  { %3319 = vmatpush1.bf16.msra.mxu1 %v4446_v13 }
 0x249   :  { %3320 = vmatprep.subr.bf16.mxu1 %v4488_v28 }
 0x24c   :  { %3321 = vmatpush1.bf16.msra.mxu1 %v4447_v18 }
 0x24d   :  { %3322 = vmatprep.subr.bf16.mxu1 %v4488_v28 }
 0x250   :  { %3323 = vmatpush1.bf16.msra.mxu1 %v3304_v24 }
 0x255   :  { %v3848_v6 = vpop.f32.mrb[12].mxu1 }
 0x256   :  { %v3849_v7 = vpop.f32.mrb[13].mxu1 }
 0x257   :  { %v3850_v8 = vadd.f32 %v3849_v7, %v3848_v6  ;;  %v3851_v9 = vpop.f32.mrb[14].mxu1 }
 0x258   :  { %v3852_v10 = vpop.f32.mrb[15].mxu1 }
 0x259   :  { %v2642_v11 = vadd.f32 %v3850_v8, %v2602_v4 }
 0x25b   :  { %v2656_v19 = vmin.f32 %v2642_v11, 0.0  ;;  %vm2651_vm5 = vcmp.gt.f32.partialorder %v2642_v11, 0.0 }
 0x25d   :  { %v2665_v31 = vmul.f32 1.442695, %v2656_v19 }
 0x25f   :  { %4457 = vpow2.f32 %v2665_v31 }
 0x269   :  { %v4458_v21 = vpop.eup %4457 }
 0x26a   :  { %v3685_v12 = vadd.f32 -1.0, %v4458_v21 }
 0x26c   :  { %v2676_v54 = vsel %vm2651_vm5, %v2642_v11, %v3685_v12 }
 0x26d   :  { %v2681_v15 = vpack.c.bf16 %v2676_v54, %v2676_v54 }
 0x26f   :  { %3753 = vmatmul.mubr.msk.bf16.vlgmr.msra.gmra.mrb[12].mxu0 %vm3084_vm6, %v2681_v15 }
 0x342   :  { %v3211_v27 = vpop.f32.mrb[12].mxu0 }
 0x343   :  { %v3860_v29 = vadd.f32 %v3211_v27, %v2752_v26  ;;  %v3213_v28 = vpop.f32.mrb[13].mxu0 }
 0x344   :  { %v3861_v30 = vadd.f32 %v3213_v28, %v2756_v36  ;;  %v3215_v32 = vpop.f32.mrb[14].mxu0 }
 0x345   :  { %v3220_v33 = vmin.f32 %v3860_v29, 0.0  ;;  %v3216_v34 = vpop.f32.mrb[15].mxu0  ;;  %vm3218_vm7 = vcmp.gt.f32.partialorder %v3860_v29, 0.0 }
 0x346   :  { %v3221_v35 = vmin.f32 %v3861_v30, 0.0  ;;  %vm3219_vm8 = vcmp.gt.f32.partialorder %v3861_v30, 0.0 }
 0x347   :  { %v3222_v37 = vmul.f32 1.442695, %v3220_v33 }
 0x348   :  { %v3224_v38 = vmul.f32 1.442695, %v3221_v35 }
 0x349   :  { %4459 = vpow2.f32 %v3222_v37 }
 0x34a   :  { %4461 = vpow2.f32 %v3224_v38 }
 0x353   :  { %v4460_v39 = vpop.eup %4459 }
 0x354   :  { %v4462_v40 = vpop.eup %4461  ;;  %v3754_v41 = vadd.f32 -1.0, %v4460_v39 }
 0x355   :  { %v3755_v23 = vadd.f32 -1.0, %v4462_v40 }
 0x356   :  { %v3228_v43 = vsel %vm3218_vm7, %v3860_v29, %v3754_v41 }
 0x357   :  { %v3229_v42 = vsel %vm3219_vm8, %v3861_v30, %v3755_v23  ;;  %v3230_v2 = vpack.c.bf16 %v3228_v43, %v3228_v43 }
 0x358   :  { %v3231_v22 = vpack.c.bf16 %v3229_v42, %v3229_v42 }
 0x35a   :  { %3765 = vmatprep.mubr.msk.bf16.mxu1 %vm3084_vm6, %v3231_v22 }
 0x35b   :  { %3339 = vmatmul.mubr.bf16.vlgmr.msra.gmra.mrb[16].mxu1 %v3230_v2 }
 0x42e   :  { %v3340_v5 = vpop.f32.mrb[16].mxu1 }
 0x42f   :  { %3346 = vst [vmem:[#allocation2] sm:$0x3] %v3340_v5  ;;  %v3342_v44 = vpop.f32.mrb[17].mxu1 }
 0x430   :  { %v3343_v45 = vpop.f32.mrb[18].mxu1 }
 0x431   :  { %4474 = shalt.err (!%p4471_p4)
}
 0x432   :  { %s4475_s13 = scalar_lea.hbm %s5840_s6, 32 }
 0x433   :  { %p4476_p5 = scmp.ne.s32.totalorder %s5840_s6, %s4475_s13  ;;  %p4479_p6 = scmp.lt.u32.totalorder %s4475_s13, %s5840_s6 }
 0x435   :  { %p4481_p7 = pnand %p4479_p6, %p4476_p5 }
 0x437   :  { %4484 = shalt.err (!%p4481_p7)
}
 0x438   :  { %3356 = dma.vmem_to_hbm [thread:$0]  %s3354_s5, 32, %s5840_s6, [#allocation3]   ;;  %v3344_v46 = vpop.f32.mrb[19].mxu1 }
 0x439   :  { %4485 = dma.done.wait [#allocation3], 32  }
 0x43a   :  { %4486 = vsyncadd [#allocation3], 4294967264 }
 0x43b   :  { %3360 = vsyncpa [#allocation3], 1 }

</bundles_post_ra>
